<compile_context>
chip_gen: v7x
topology: tpu7x:2x2x1
jax: 0.10.0
libtpu: 0.0.40
codegen_flags: <defaults>
</compile_context>

<pallas_src>
import functools

import jax
import jax.numpy as jnp
from jax.experimental import pallas as pl
from jax.experimental.pallas import tpu as pltpu


def _ia_kernel(x_ref, w1_ref, b1_ref, w2t_ref, b2_ref, dww_ref, dwb_ref, o_ref, acc_ref,
               *, approx_sigmoid):
    # x_ref:   (Bt, H, W, C)    raw (unpadded) activation block, C on lanes
    # w1_ref:  (Cr, C)          Conv2d(C, Cr, 1).weight
    # b1_ref:  (Cr, 1)
    # w2t_ref: (Cr, C)          Conv2d(Cr, C, 1).weight.T
    # b2_ref:  (1, C)
    # dww_ref: (9, C)           depthwise 3x3 taps, row index = ki*3 + kj
    # dwb_ref: (1, C)
    # o_ref:   (Bt, Ho, Wo, C)  sigmoid(ca + sa)
    # acc_ref: (Bt, Ho, Wo, C)  f32 VMEM scratch accumulator for the depthwise conv
    Bt, H, W, C = x_ref.shape
    _, Ho, Wo, _ = o_ref.shape
    f32 = jnp.float32

    # ---- read-once deinterleave: four stride-2 slabs (each input element read exactly once) ----
    ee = x_ref[:, pl.ds(0, Ho, stride=2), pl.ds(0, Wo, stride=2), :].astype(f32)  # x[:, 0::2, 0::2]
    eo = x_ref[:, pl.ds(0, Ho, stride=2), pl.ds(1, Wo, stride=2), :].astype(f32)  # x[:, 0::2, 1::2]
    oe = x_ref[:, pl.ds(1, Ho, stride=2), pl.ds(0, Wo, stride=2), :].astype(f32)  # x[:, 1::2, 0::2]
    oo = x_ref[:, pl.ds(1, Ho, stride=2), pl.ds(1, Wo, stride=2), :].astype(f32)  # x[:, 1::2, 1::2]

    dww = dww_ref[...].astype(f32)                    # (9, C)

    def tap(k):                                       # lane-aligned (1, C) tap weight, k = ki*3+kj
        return dww[k:k + 1]

    # ---- spatial attention: depthwise 3x3, stride 2, pad 1 (zero padding folded in) ----
    # Output (i, j) reads input rows {2i-1, 2i, 2i+1} and cols {2j-1, 2j, 2j+1}.  With even H, W
    # only the "up"/"left" taps (ki==0 / kj==0) ever touch the zero pad, so they are shifted-slab
    # contributions added to the accumulator interior.
    acc_ref[...] = (ee * tap(4) + eo * tap(5) + oe * tap(7) + oo * tap(8)
                    + dwb_ref[...].astype(f32))
    if Wo > 1:  # taps looking one column left (kj == 0): out[:, :, j] += slab[:, :, j-1]
        acc_ref[:, :, 1:, :] = acc_ref[:, :, 1:, :] + (
            eo[:, :, :Wo - 1, :] * tap(3) + oo[:, :, :Wo - 1, :] * tap(6))
    if Ho > 1:  # taps looking one row up (ki == 0): out[:, i] += slab[:, i-1]
        acc_ref[:, 1:, :, :] = acc_ref[:, 1:, :, :] + (
            oe[:, :Ho - 1, :, :] * tap(1) + oo[:, :Ho - 1, :, :] * tap(2))
    if Ho > 1 and Wo > 1:  # corner tap (0, 0)
        acc_ref[:, 1:, 1:, :] = acc_ref[:, 1:, 1:, :] + oo[:, :Ho - 1, :Wo - 1, :] * tap(0)

    # ---- channel attention: global average pool (the 4 slabs partition x) + two tiny 1x1 convs ----
    s4 = ee + eo + oe + oo                                            # (Bt, Ho, Wo, C)
    pooled = jnp.sum(jnp.sum(s4, axis=1), axis=1) * (1.0 / float(H * W))   # (Bt, C)

    w1 = w1_ref[...].astype(f32)                      # (Cr, C)
    b1 = b1_ref[...].astype(f32)                      # (Cr, 1)
    w2t = w2t_ref[...].astype(f32)                    # (Cr, C)
    b2 = b2_ref[...].astype(f32)                      # (1, C)

    for b in range(Bt):                               # static unroll; Bt is small
        avg_b = pooled[b:b + 1, :]                                        # (1, C)
        h = jnp.sum(avg_b * w1, axis=1, keepdims=True) + b1               # (Cr, 1)  lane reduce
        h = jnp.maximum(h, 0.0)
        ca = jnp.sum(h * w2t, axis=0, keepdims=True) + b2                 # (1, C)   sublane reduce

        z = acc_ref[b] + ca                                               # (Ho, Wo, C)
        e = jnp.exp(-z)                                                   # EUP
        if approx_sigmoid:
            out_b = pl.reciprocal(1.0 + e, approx=True)                   # EUP (frees VALU slots)
        else:
            out_b = 1.0 / (1.0 + e)                                       # exact (parity tests)
        o_ref[b] = out_b.astype(o_ref.dtype)


def _round_up(v, m):
    return ((v + m - 1) // m) * m


def ia_layer_pallas_nhwc(x_nhwc, params, *, batch_tile=1, approx_sigmoid=True):
    """IALayer forward on an NHWC activation: (B, H, W, C) -> (B, H//2, W//2, C).

    Preferred entry point: no pad / transpose glue around the pallas_call, so the
    activation makes one HBM round trip.  Input may be float32 or bfloat16
    (accumulation is float32 in-kernel; output dtype matches the input).
    """
    B, H, W, C = x_nhwc.shape
    if H % 2 != 0 or W % 2 != 0:
        raise ValueError("ia_layer_pallas_nhwc requires even spatial dims (stride-2 deinterleave)")
    if B % batch_tile != 0:
        raise ValueError("batch_tile must divide the batch size")
    Bt = batch_tile
    Cr = params["w1"].shape[0]
    Ho, Wo = H // 2, W // 2

    # Tiny parameter prep: everything lane-aligned with channels on the 128-lane axis.
    w1 = params["w1"].reshape(Cr, C).astype(jnp.float32)          # (Cr, C)
    b1 = params["b1"].reshape(Cr, 1).astype(jnp.float32)          # (Cr, 1)
    w2t = params["w2"].reshape(C, Cr).T.astype(jnp.float32)       # (Cr, C)
    b2 = params["b2"].reshape(1, C).astype(jnp.float32)           # (1, C)
    dww = params["dw_w"].reshape(C, 9).T.astype(jnp.float32)      # (9, C), row = ki*3 + kj
    dwb = params["dw_b"].reshape(1, C).astype(jnp.float32)        # (1, C)

    kernel = functools.partial(_ia_kernel, approx_sigmoid=approx_sigmoid)

    # VMEM budget: double-buffered input + output blocks plus the f32 accumulator scratch
    # (C padded to 128 lanes, W/Wo to the sublane granule).  Raise the scoped limit above
    # v5e's 16 MiB default; clamp so small problems stay modest.
    itm = jnp.dtype(x_nhwc.dtype).itemsize
    sub = max(8, 32 // itm)
    in_blk = Bt * H * _round_up(W, sub) * _round_up(C, 128) * itm
    out_blk = Bt * Ho * _round_up(Wo, sub) * _round_up(C, 128) * itm
    acc_blk = Bt * Ho * _round_up(Wo, 8) * _round_up(C, 128) * 4
    vmem_limit = int(min(max(2 * (in_blk + out_blk) + acc_blk + (16 << 20), 32 << 20), 100 << 20))

    flops = B * Ho * Wo * C * (2 * 9 + 8) + B * H * W * C + 4 * B * C * Cr
    bytes_accessed = (B * H * W * C + B * Ho * Wo * C) * itm + (2 * Cr * C + Cr + 11 * C) * 4

    grid = (B // Bt,)
    out = pl.pallas_call(
        kernel,
        out_shape=jax.ShapeDtypeStruct((B, Ho, Wo, C), x_nhwc.dtype),
        grid=grid,
        in_specs=[
            pl.BlockSpec((Bt, H, W, C), lambda g: (g, 0, 0, 0)),
            pl.BlockSpec((Cr, C), lambda g: (0, 0)),
            pl.BlockSpec((Cr, 1), lambda g: (0, 0)),
            pl.BlockSpec((Cr, C), lambda g: (0, 0)),
            pl.BlockSpec((1, C), lambda g: (0, 0)),
            pl.BlockSpec((9, C), lambda g: (0, 0)),
            pl.BlockSpec((1, C), lambda g: (0, 0)),
        ],
        out_specs=pl.BlockSpec((Bt, Ho, Wo, C), lambda g: (g, 0, 0, 0)),
        scratch_shapes=[pltpu.VMEM((Bt, Ho, Wo, C), jnp.float32)],
        compiler_params=pltpu.CompilerParams(
            dimension_semantics=("parallel",),
            vmem_limit_bytes=vmem_limit,
        ),
        cost_estimate=pl.CostEstimate(
            flops=int(flops),
            transcendentals=int(B * Ho * Wo * C),
            bytes_accessed=int(bytes_accessed),
        ),
    )(x_nhwc, w1, b1, w2t, b2, dww, dwb)
    return out


def ia_layer_pallas(x_nchw, params, *, batch_tile=1, approx_sigmoid=True):
    """PyTorch-layout (NCHW) compatibility wrapper: (B, C, H, W) -> (B, C, H//2, W//2).

    Adds two layout transposes (full HBM round trips) around the NHWC kernel; prefer keeping
    the surrounding model in NHWC and calling `ia_layer_pallas_nhwc` directly.
    """
    x_nhwc = jnp.transpose(x_nchw, (0, 2, 3, 1))
    out = ia_layer_pallas_nhwc(x_nhwc, params, batch_tile=batch_tile,
                               approx_sigmoid=approx_sigmoid)
    return jnp.transpose(out, (0, 3, 1, 2))


def ia_layer_reference(x_nchw, params):
    """Plain-JAX reference matching the PyTorch forward (use_ca=True, use_sa=True)."""
    B, C, H, W = x_nchw.shape
    v = jnp.mean(x_nchw, axis=(2, 3))                               # (B, C)
    h = jnp.maximum(v @ params["w1"].T + params["b1"], 0.0)         # (B, Cr)
    ca = (h @ params["w2"].T + params["b2"])[:, :, None, None]      # (B, C, 1, 1)
    sa = jax.lax.conv_general_dilated(
        x_nchw, params["dw_w"], window_strides=(2, 2),
        padding=((1, 1), (1, 1)),
        dimension_numbers=("NCHW", "OIHW", "NCHW"),
        feature_group_count=C)
    sa = sa + params["dw_b"][None, :, None, None]
    return jax.nn.sigmoid(ca + sa)


if __name__ == "__main__":
    key = jax.random.PRNGKey(0)
    B, C, H, W = 2, 32, 16, 16
    reduction = 16
    Cr = C // reduction

    ks = jax.random.split(key, 7)
    x_nchw = jax.random.normal(ks[0], (B, C, H, W), jnp.float32)
    params = dict(
        w1=jax.random.normal(ks[1], (Cr, C), jnp.float32) * 0.1,        # Conv2d(C, Cr, 1).weight
        b1=jax.random.normal(ks[2], (Cr,), jnp.float32) * 0.1,
        b2=jax.random.normal(ks[4], (C,), jnp.float32) * 0.1,
        w2=jax.random.normal(ks[3], (C, Cr), jnp.float32) * 0.1,        # Conv2d(Cr, C, 1).weight
        dw_w=jax.random.normal(ks[5], (C, 1, 3, 3), jnp.float32) * 0.1, # depthwise conv weight
        dw_b=jax.random.normal(ks[6], (C,), jnp.float32) * 0.1,
    )

    ref_nchw = ia_layer_reference(x_nchw, params)
    ref_nhwc = jnp.transpose(ref_nchw, (0, 2, 3, 1))

    # 1) primary NHWC entry point (no layout glue), exact sigmoid, two images per grid step.
    x_nhwc = jnp.transpose(x_nchw, (0, 2, 3, 1))   # test-only conversion of the random NCHW data
    out_nhwc = jax.block_until_ready(
        ia_layer_pallas_nhwc(x_nhwc, params, batch_tile=2, approx_sigmoid=False))
    assert out_nhwc.shape == (B, H // 2, W // 2, C), out_nhwc.shape
    if not bool(jnp.allclose(out_nhwc, ref_nhwc, atol=1e-5, rtol=1e-5)):
        raise AssertionError("NHWC Pallas kernel output does not match JAX reference")

    # 2) NCHW (PyTorch-layout) wrapper, EUP approximate-reciprocal sigmoid, one image per step.
    out_nchw = jax.block_until_ready(
        ia_layer_pallas(x_nchw, params, batch_tile=1, approx_sigmoid=True))
    assert out_nchw.shape == (B, C, H // 2, W // 2), out_nchw.shape
    if not bool(jnp.allclose(out_nchw, ref_nchw, atol=5e-2, rtol=5e-2)):
        raise AssertionError("NCHW Pallas wrapper output does not match JAX reference")

    print("KERNEL_OK")
</pallas_src>

<mosaic_0001>
module attributes {stable_mosaic.version = 11 : i64} {
  func.func @_ia_kernel(%arg0: i32, %arg1: memref<2x16x16x32xf32, #tpu.memory_space<vmem>>, %arg2: memref<2x32xf32, #tpu.memory_space<vmem>>, %arg3: memref<2x1xf32, #tpu.memory_space<vmem>>, %arg4: memref<2x32xf32, #tpu.memory_space<vmem>>, %arg5: memref<1x32xf32, #tpu.memory_space<vmem>>, %arg6: memref<9x32xf32, #tpu.memory_space<vmem>>, %arg7: memref<1x32xf32, #tpu.memory_space<vmem>>, %arg8: memref<2x8x8x32xf32, #tpu.memory_space<vmem>>, %arg9: memref<2x8x8x32xf32, #tpu.memory_space<vmem>>) attributes {dimension_semantics = [#tpu.dimension_semantics<parallel>], iteration_bounds = array<i64: 1>, scalar_prefetch = 0 : i64, scratch_operands = 1 : i64, tpu.core_type = #tpu.core_type<tc>, window_params = [{transform_indices = @transform_0, window_bounds = array<i64: 2, 16, 16, 32>}, {pipeline_mode = #tpu.pipeline_mode<synchronous>, transform_indices = @transform_1, window_bounds = array<i64: 2, 32>}, {pipeline_mode = #tpu.pipeline_mode<synchronous>, transform_indices = @transform_2, window_bounds = array<i64: 2, 1>}, {pipeline_mode = #tpu.pipeline_mode<synchronous>, transform_indices = @transform_3, window_bounds = array<i64: 2, 32>}, {pipeline_mode = #tpu.pipeline_mode<synchronous>, transform_indices = @transform_4, window_bounds = array<i64: 1, 32>}, {pipeline_mode = #tpu.pipeline_mode<synchronous>, transform_indices = @transform_5, window_bounds = array<i64: 9, 32>}, {pipeline_mode = #tpu.pipeline_mode<synchronous>, transform_indices = @transform_6, window_bounds = array<i64: 1, 32>}, {transform_indices = @transform_7, window_bounds = array<i64: 2, 8, 8, 32>}]} {
    %c0 = arith.constant 0 : index
    %c0_0 = arith.constant 0 : index
    %c0_1 = arith.constant 0 : index
    %c0_2 = arith.constant 0 : index
    %0 = tpu.strided_load %arg1[%c0, %c0_0, %c0_1, %c0_2] {strides = array<i32: 1, 2, 2, 1>} : memref<2x16x16x32xf32, #tpu.memory_space<vmem>>, vector<2x8x8x32xf32>
    %c0_3 = arith.constant 0 : index
    %c0_4 = arith.constant 0 : index
    %c1 = arith.constant 1 : index
    %c0_5 = arith.constant 0 : index
    %1 = tpu.strided_load %arg1[%c0_3, %c0_4, %c1, %c0_5] {strides = array<i32: 1, 2, 2, 1>} : memref<2x16x16x32xf32, #tpu.memory_space<vmem>>, vector<2x8x8x32xf32>
    %c0_6 = arith.constant 0 : index
    %c1_7 = arith.constant 1 : index
    %c0_8 = arith.constant 0 : index
    %c0_9 = arith.constant 0 : index
    %2 = tpu.strided_load %arg1[%c0_6, %c1_7, %c0_8, %c0_9] {strides = array<i32: 1, 2, 2, 1>} : memref<2x16x16x32xf32, #tpu.memory_space<vmem>>, vector<2x8x8x32xf32>
    %c0_10 = arith.constant 0 : index
    %c1_11 = arith.constant 1 : index
    %c1_12 = arith.constant 1 : index
    %c0_13 = arith.constant 0 : index
    %3 = tpu.strided_load %arg1[%c0_10, %c1_11, %c1_12, %c0_13] {strides = array<i32: 1, 2, 2, 1>} : memref<2x16x16x32xf32, #tpu.memory_space<vmem>>, vector<2x8x8x32xf32>
    %c0_14 = arith.constant 0 : index
    %c0_15 = arith.constant 0 : index
    %4 = vector.load %arg6[%c0_14, %c0_15] : memref<9x32xf32, #tpu.memory_space<vmem>>, vector<9x32xf32>
    %5 = vector.extract_strided_slice %4 {offsets = [4, 0], sizes = [1, 32], strides = [1, 1]} : vector<9x32xf32> to vector<1x32xf32>
    %6 = vector.shape_cast %5 : vector<1x32xf32> to vector<1x1x1x32xf32>
    %7 = vector.broadcast %6 : vector<1x1x1x32xf32> to vector<2x8x8x32xf32>
    %8 = arith.mulf %0, %7 : vector<2x8x8x32xf32>
    %9 = vector.extract_strided_slice %4 {offsets = [5, 0], sizes = [1, 32], strides = [1, 1]} : vector<9x32xf32> to vector<1x32xf32>
    %10 = vector.shape_cast %9 : vector<1x32xf32> to vector<1x1x1x32xf32>
    %11 = vector.broadcast %10 : vector<1x1x1x32xf32> to vector<2x8x8x32xf32>
    %12 = arith.mulf %1, %11 : vector<2x8x8x32xf32>
    %13 = arith.addf %8, %12 : vector<2x8x8x32xf32>
    %14 = vector.extract_strided_slice %4 {offsets = [7, 0], sizes = [1, 32], strides = [1, 1]} : vector<9x32xf32> to vector<1x32xf32>
    %15 = vector.shape_cast %14 : vector<1x32xf32> to vector<1x1x1x32xf32>
    %16 = vector.broadcast %15 : vector<1x1x1x32xf32> to vector<2x8x8x32xf32>
    %17 = arith.mulf %2, %16 : vector<2x8x8x32xf32>
    %18 = arith.addf %13, %17 : vector<2x8x8x32xf32>
    %19 = vector.extract_strided_slice %4 {offsets = [8, 0], sizes = [1, 32], strides = [1, 1]} : vector<9x32xf32> to vector<1x32xf32>
    %20 = vector.shape_cast %19 : vector<1x32xf32> to vector<1x1x1x32xf32>
    %21 = vector.broadcast %20 : vector<1x1x1x32xf32> to vector<2x8x8x32xf32>
    %22 = arith.mulf %3, %21 : vector<2x8x8x32xf32>
    %23 = arith.addf %18, %22 : vector<2x8x8x32xf32>
    %c0_16 = arith.constant 0 : index
    %c0_17 = arith.constant 0 : index
    %24 = vector.load %arg7[%c0_16, %c0_17] : memref<1x32xf32, #tpu.memory_space<vmem>>, vector<1x32xf32>
    %25 = vector.shape_cast %24 : vector<1x32xf32> to vector<1x1x1x32xf32>
    %26 = vector.broadcast %25 : vector<1x1x1x32xf32> to vector<2x8x8x32xf32>
    %27 = arith.addf %23, %26 : vector<2x8x8x32xf32>
    %c0_18 = arith.constant 0 : index
    %c0_19 = arith.constant 0 : index
    %c0_20 = arith.constant 0 : index
    %c0_21 = arith.constant 0 : index
    %28 = vector.load %arg9[%c0_18, %c0_19, %c0_20, %c0_21] : memref<2x8x8x32xf32, #tpu.memory_space<vmem>>, vector<2x8x8x32xf32>
    tpu.vector_store %arg9[%c0_18, %c0_19, %c0_20, %c0_21], %27 {strides = array<i32>} : memref<2x8x8x32xf32, #tpu.memory_space<vmem>>, vector<2x8x8x32xf32>,
    %c0_22 = arith.constant 0 : index
    %c0_23 = arith.constant 0 : index
    %c1_24 = arith.constant 1 : index
    %c0_25 = arith.constant 0 : index
    %29 = vector.load %arg9[%c0_22, %c0_23, %c1_24, %c0_25] : memref<2x8x8x32xf32, #tpu.memory_space<vmem>>, vector<2x8x7x32xf32>
    %30 = vector.extract_strided_slice %1 {offsets = [0, 0, 0, 0], sizes = [2, 8, 7, 32], strides = [1, 1, 1, 1]} : vector<2x8x8x32xf32> to vector<2x8x7x32xf32>
    %31 = vector.extract_strided_slice %4 {offsets = [3, 0], sizes = [1, 32], strides = [1, 1]} : vector<9x32xf32> to vector<1x32xf32>
    %32 = vector.shape_cast %31 : vector<1x32xf32> to vector<1x1x1x32xf32>
    %33 = vector.broadcast %32 : vector<1x1x1x32xf32> to vector<2x8x7x32xf32>
    %34 = arith.mulf %30, %33 : vector<2x8x7x32xf32>
    %35 = vector.extract_strided_slice %3 {offsets = [0, 0, 0, 0], sizes = [2, 8, 7, 32], strides = [1, 1, 1, 1]} : vector<2x8x8x32xf32> to vector<2x8x7x32xf32>
    %36 = vector.extract_strided_slice %4 {offsets = [6, 0], sizes = [1, 32], strides = [1, 1]} : vector<9x32xf32> to vector<1x32xf32>
    %37 = vector.shape_cast %36 : vector<1x32xf32> to vector<1x1x1x32xf32>
    %38 = vector.broadcast %37 : vector<1x1x1x32xf32> to vector<2x8x7x32xf32>
    %39 = arith.mulf %35, %38 : vector<2x8x7x32xf32>
    %40 = arith.addf %34, %39 : vector<2x8x7x32xf32>
    %41 = arith.addf %29, %40 : vector<2x8x7x32xf32>
    %c0_26 = arith.constant 0 : index
    %c0_27 = arith.constant 0 : index
    %c1_28 = arith.constant 1 : index
    %c0_29 = arith.constant 0 : index
    %42 = vector.load %arg9[%c0_26, %c0_27, %c1_28, %c0_29] : memref<2x8x8x32xf32, #tpu.memory_space<vmem>>, vector<2x8x7x32xf32>
    tpu.vector_store %arg9[%c0_26, %c0_27, %c1_28, %c0_29], %41 {strides = array<i32>} : memref<2x8x8x32xf32, #tpu.memory_space<vmem>>, vector<2x8x7x32xf32>,
    %c0_30 = arith.constant 0 : index
    %c1_31 = arith.constant 1 : index
    %c0_32 = arith.constant 0 : index
    %c0_33 = arith.constant 0 : index
    %43 = vector.load %arg9[%c0_30, %c1_31, %c0_32, %c0_33] : memref<2x8x8x32xf32, #tpu.memory_space<vmem>>, vector<2x7x8x32xf32>
    %44 = vector.extract_strided_slice %2 {offsets = [0, 0, 0, 0], sizes = [2, 7, 8, 32], strides = [1, 1, 1, 1]} : vector<2x8x8x32xf32> to vector<2x7x8x32xf32>
    %45 = vector.extract_strided_slice %4 {offsets = [1, 0], sizes = [1, 32], strides = [1, 1]} : vector<9x32xf32> to vector<1x32xf32>
    %46 = vector.shape_cast %45 : vector<1x32xf32> to vector<1x1x1x32xf32>
    %47 = vector.broadcast %46 : vector<1x1x1x32xf32> to vector<2x7x8x32xf32>
    %48 = arith.mulf %44, %47 : vector<2x7x8x32xf32>
    %49 = vector.extract_strided_slice %3 {offsets = [0, 0, 0, 0], sizes = [2, 7, 8, 32], strides = [1, 1, 1, 1]} : vector<2x8x8x32xf32> to vector<2x7x8x32xf32>
    %50 = vector.extract_strided_slice %4 {offsets = [2, 0], sizes = [1, 32], strides = [1, 1]} : vector<9x32xf32> to vector<1x32xf32>
    %51 = vector.shape_cast %50 : vector<1x32xf32> to vector<1x1x1x32xf32>
    %52 = vector.broadcast %51 : vector<1x1x1x32xf32> to vector<2x7x8x32xf32>
    %53 = arith.mulf %49, %52 : vector<2x7x8x32xf32>
    %54 = arith.addf %48, %53 : vector<2x7x8x32xf32>
    %55 = arith.addf %43, %54 : vector<2x7x8x32xf32>
    %c0_34 = arith.constant 0 : index
    %c1_35 = arith.constant 1 : index
    %c0_36 = arith.constant 0 : index
    %c0_37 = arith.constant 0 : index
    %56 = vector.load %arg9[%c0_34, %c1_35, %c0_36, %c0_37] : memref<2x8x8x32xf32, #tpu.memory_space<vmem>>, vector<2x7x8x32xf32>
    tpu.vector_store %arg9[%c0_34, %c1_35, %c0_36, %c0_37], %55 {strides = array<i32>} : memref<2x8x8x32xf32, #tpu.memory_space<vmem>>, vector<2x7x8x32xf32>,
    %c0_38 = arith.constant 0 : index
    %c1_39 = arith.constant 1 : index
    %c1_40 = arith.constant 1 : index
    %c0_41 = arith.constant 0 : index
    %57 = vector.load %arg9[%c0_38, %c1_39, %c1_40, %c0_41] : memref<2x8x8x32xf32, #tpu.memory_space<vmem>>, vector<2x7x7x32xf32>
    %58 = vector.extract_strided_slice %3 {offsets = [0, 0, 0, 0], sizes = [2, 7, 7, 32], strides = [1, 1, 1, 1]} : vector<2x8x8x32xf32> to vector<2x7x7x32xf32>
    %59 = vector.extract_strided_slice %4 {offsets = [0, 0], sizes = [1, 32], strides = [1, 1]} : vector<9x32xf32> to vector<1x32xf32>
    %60 = vector.shape_cast %59 : vector<1x32xf32> to vector<1x1x1x32xf32>
    %61 = vector.broadcast %60 : vector<1x1x1x32xf32> to vector<2x7x7x32xf32>
    %62 = arith.mulf %58, %61 : vector<2x7x7x32xf32>
    %63 = arith.addf %57, %62 : vector<2x7x7x32xf32>
    %c0_42 = arith.constant 0 : index
    %c1_43 = arith.constant 1 : index
    %c1_44 = arith.constant 1 : index
    %c0_45 = arith.constant 0 : index
    %64 = vector.load %arg9[%c0_42, %c1_43, %c1_44, %c0_45] : memref<2x8x8x32xf32, #tpu.memory_space<vmem>>, vector<2x7x7x32xf32>
    tpu.vector_store %arg9[%c0_42, %c1_43, %c1_44, %c0_45], %63 {strides = array<i32>} : memref<2x8x8x32xf32, #tpu.memory_space<vmem>>, vector<2x7x7x32xf32>,
    %65 = arith.addf %0, %1 : vector<2x8x8x32xf32>
    %66 = arith.addf %65, %2 : vector<2x8x8x32xf32>
    %67 = arith.addf %66, %3 : vector<2x8x8x32xf32>
    %cst = arith.constant dense<0.000000e+00> : vector<2x8x32xf32>
    %68 = vector.multi_reduction <add>, %67, %cst [1] : vector<2x8x8x32xf32> to vector<2x8x32xf32>
    %cst_46 = arith.constant dense<0.000000e+00> : vector<2x32xf32>
    %69 = vector.multi_reduction <add>, %68, %cst_46 [1] : vector<2x8x32xf32> to vector<2x32xf32>
    %cst_47 = arith.constant 3.906250e-03 : f32
    %70 = vector.broadcast %cst_47 : f32 to vector<2x32xf32>
    %71 = arith.mulf %69, %70 : vector<2x32xf32>
    %c0_48 = arith.constant 0 : index
    %c0_49 = arith.constant 0 : index
    %72 = vector.load %arg2[%c0_48, %c0_49] : memref<2x32xf32, #tpu.memory_space<vmem>>, vector<2x32xf32>
    %c0_50 = arith.constant 0 : index
    %c0_51 = arith.constant 0 : index
    %73 = vector.load %arg3[%c0_50, %c0_51] : memref<2x1xf32, #tpu.memory_space<vmem>>, vector<2x1xf32>
    %c0_52 = arith.constant 0 : index
    %c0_53 = arith.constant 0 : index
    %74 = vector.load %arg4[%c0_52, %c0_53] : memref<2x32xf32, #tpu.memory_space<vmem>>, vector<2x32xf32>
    %c0_54 = arith.constant 0 : index
    %c0_55 = arith.constant 0 : index
    %75 = vector.load %arg5[%c0_54, %c0_55] : memref<1x32xf32, #tpu.memory_space<vmem>>, vector<1x32xf32>
    %76 = vector.extract_strided_slice %71 {offsets = [0, 0], sizes = [1, 32], strides = [1, 1]} : vector<2x32xf32> to vector<1x32xf32>
    %77 = vector.broadcast %76 : vector<1x32xf32> to vector<2x32xf32>
    %78 = arith.mulf %77, %72 : vector<2x32xf32>
    %cst_56 = arith.constant dense<0.000000e+00> : vector<2xf32>
    %79 = vector.multi_reduction <add>, %78, %cst_56 [1] : vector<2x32xf32> to vector<2xf32>
    %80 = vector.shape_cast %79 : vector<2xf32> to vector<2x1xf32>
    %81 = arith.addf %80, %73 : vector<2x1xf32>
    %cst_57 = arith.constant 0.000000e+00 : f32
    %82 = vector.broadcast %cst_57 : f32 to vector<2x1xf32>
    %83 = arith.maximumf %81, %82 : vector<2x1xf32>
    %84 = vector.broadcast %83 : vector<2x1xf32> to vector<2x32xf32>
    %85 = arith.mulf %84, %74 : vector<2x32xf32>
    %cst_58 = arith.constant dense<0.000000e+00> : vector<32xf32>
    %86 = vector.multi_reduction <add>, %85, %cst_58 [0] : vector<2x32xf32> to vector<32xf32>
    %87 = vector.shape_cast %86 : vector<32xf32> to vector<1x32xf32>
    %88 = arith.addf %87, %75 : vector<1x32xf32>
    %c0_59 = arith.constant 0 : index
    %c0_60 = arith.constant 0 : index
    %c0_61 = arith.constant 0 : index
    %c0_62 = arith.constant 0 : index
    %89 = vector.load %arg9[%c0_59, %c0_60, %c0_61, %c0_62] : memref<2x8x8x32xf32, #tpu.memory_space<vmem>>, vector<1x8x8x32xf32>
    %90 = vector.shape_cast %89 : vector<1x8x8x32xf32> to vector<8x8x32xf32>
    %91 = vector.shape_cast %88 : vector<1x32xf32> to vector<1x1x32xf32>
    %92 = vector.broadcast %91 : vector<1x1x32xf32> to vector<8x8x32xf32>
    %93 = arith.addf %90, %92 : vector<8x8x32xf32>
    %cst_63 = arith.constant 0.000000e+00 : f32
    %94 = vector.broadcast %cst_63 : f32 to vector<8x8x32xf32>
    %95 = arith.subf %94, %93 : vector<8x8x32xf32>
    %96 = math.exp %95 : vector<8x8x32xf32>
    %cst_64 = arith.constant 1.000000e+00 : f32
    %97 = vector.broadcast %cst_64 : f32 to vector<8x8x32xf32>
    %98 = arith.addf %97, %96 : vector<8x8x32xf32>
    %cst_65 = arith.constant 1.000000e+00 : f32
    %99 = vector.broadcast %cst_65 : f32 to vector<8x8x32xf32>
    %100 = arith.divf %99, %98 : vector<8x8x32xf32>
    %c0_66 = arith.constant 0 : index
    %c0_67 = arith.constant 0 : index
    %c0_68 = arith.constant 0 : index
    %c0_69 = arith.constant 0 : index
    %101 = vector.load %arg8[%c0_66, %c0_67, %c0_68, %c0_69] : memref<2x8x8x32xf32, #tpu.memory_space<vmem>>, vector<1x8x8x32xf32>
    %102 = vector.shape_cast %101 : vector<1x8x8x32xf32> to vector<8x8x32xf32>
    %103 = vector.shape_cast %100 : vector<8x8x32xf32> to vector<1x8x8x32xf32>
    tpu.vector_store %arg8[%c0_66, %c0_67, %c0_68, %c0_69], %103 {strides = array<i32>} : memref<2x8x8x32xf32, #tpu.memory_space<vmem>>, vector<1x8x8x32xf32>,
    %104 = vector.extract_strided_slice %71 {offsets = [1, 0], sizes = [1, 32], strides = [1, 1]} : vector<2x32xf32> to vector<1x32xf32>
    %105 = vector.broadcast %104 : vector<1x32xf32> to vector<2x32xf32>
    %106 = arith.mulf %105, %72 : vector<2x32xf32>
    %cst_70 = arith.constant dense<0.000000e+00> : vector<2xf32>
    %107 = vector.multi_reduction <add>, %106, %cst_70 [1] : vector<2x32xf32> to vector<2xf32>
    %108 = vector.shape_cast %107 : vector<2xf32> to vector<2x1xf32>
    %109 = arith.addf %108, %73 : vector<2x1xf32>
    %cst_71 = arith.constant 0.000000e+00 : f32
    %110 = vector.broadcast %cst_71 : f32 to vector<2x1xf32>
    %111 = arith.maximumf %109, %110 : vector<2x1xf32>
    %112 = vector.broadcast %111 : vector<2x1xf32> to vector<2x32xf32>
    %113 = arith.mulf %112, %74 : vector<2x32xf32>
    %cst_72 = arith.constant dense<0.000000e+00> : vector<32xf32>
    %114 = vector.multi_reduction <add>, %113, %cst_72 [0] : vector<2x32xf32> to vector<32xf32>
    %115 = vector.shape_cast %114 : vector<32xf32> to vector<1x32xf32>
    %116 = arith.addf %115, %75 : vector<1x32xf32>
    %c1_73 = arith.constant 1 : index
    %c0_74 = arith.constant 0 : index
    %c0_75 = arith.constant 0 : index
    %c0_76 = arith.constant 0 : index
    %117 = vector.load %arg9[%c1_73, %c0_74, %c0_75, %c0_76] : memref<2x8x8x32xf32, #tpu.memory_space<vmem>>, vector<1x8x8x32xf32>
    %118 = vector.shape_cast %117 : vector<1x8x8x32xf32> to vector<8x8x32xf32>
    %119 = vector.shape_cast %116 : vector<1x32xf32> to vector<1x1x32xf32>
    %120 = vector.broadcast %119 : vector<1x1x32xf32> to vector<8x8x32xf32>
    %121 = arith.addf %118, %120 : vector<8x8x32xf32>
    %cst_77 = arith.constant 0.000000e+00 : f32
    %122 = vector.broadcast %cst_77 : f32 to vector<8x8x32xf32>
    %123 = arith.subf %122, %121 : vector<8x8x32xf32>
    %124 = math.exp %123 : vector<8x8x32xf32>
    %cst_78 = arith.constant 1.000000e+00 : f32
    %125 = vector.broadcast %cst_78 : f32 to vector<8x8x32xf32>
    %126 = arith.addf %125, %124 : vector<8x8x32xf32>
    %cst_79 = arith.constant 1.000000e+00 : f32
    %127 = vector.broadcast %cst_79 : f32 to vector<8x8x32xf32>
    %128 = arith.divf %127, %126 : vector<8x8x32xf32>
    %c1_80 = arith.constant 1 : index
    %c0_81 = arith.constant 0 : index
    %c0_82 = arith.constant 0 : index
    %c0_83 = arith.constant 0 : index
    %129 = vector.load %arg8[%c1_80, %c0_81, %c0_82, %c0_83] : memref<2x8x8x32xf32, #tpu.memory_space<vmem>>, vector<1x8x8x32xf32>
    %130 = vector.shape_cast %129 : vector<1x8x8x32xf32> to vector<8x8x32xf32>
    %131 = vector.shape_cast %128 : vector<8x8x32xf32> to vector<1x8x8x32xf32>
    tpu.vector_store %arg8[%c1_80, %c0_81, %c0_82, %c0_83], %131 {strides = array<i32>} : memref<2x8x8x32xf32, #tpu.memory_space<vmem>>, vector<1x8x8x32xf32>,
    return
  }
  func.func @transform_0(%arg0: i32) -> (i32, i32, i32, i32) {
    %c0_i32 = arith.constant 0 : i32
    %c0_i32_0 = arith.constant 0 : i32
    %c0_i32_1 = arith.constant 0 : i32
    %c0_i32_2 = arith.constant 0 : i32
    return %arg0, %c0_i32, %c0_i32_0, %c0_i32_1 : i32, i32, i32, i32
  }
  func.func @transform_1(%arg0: i32) -> (i32, i32) {
    %c0_i32 = arith.constant 0 : i32
    %c0_i32_0 = arith.constant 0 : i32
    %c0_i32_1 = arith.constant 0 : i32
    return %c0_i32, %c0_i32_0 : i32, i32
  }
  func.func @transform_2(%arg0: i32) -> (i32, i32) {
    %c0_i32 = arith.constant 0 : i32
    %c0_i32_0 = arith.constant 0 : i32
    %c0_i32_1 = arith.constant 0 : i32
    return %c0_i32, %c0_i32_0 : i32, i32
  }
  func.func @transform_3(%arg0: i32) -> (i32, i32) {
    %c0_i32 = arith.constant 0 : i32
    %c0_i32_0 = arith.constant 0 : i32
    %c0_i32_1 = arith.constant 0 : i32
    return %c0_i32, %c0_i32_0 : i32, i32
  }
  func.func @transform_4(%arg0: i32) -> (i32, i32) {
    %c0_i32 = arith.constant 0 : i32
    %c0_i32_0 = arith.constant 0 : i32
    %c0_i32_1 = arith.constant 0 : i32
    return %c0_i32, %c0_i32_0 : i32, i32
  }
  func.func @transform_5(%arg0: i32) -> (i32, i32) {
    %c0_i32 = arith.constant 0 : i32
    %c0_i32_0 = arith.constant 0 : i32
    %c0_i32_1 = arith.constant 0 : i32
    return %c0_i32, %c0_i32_0 : i32, i32
  }
  func.func @transform_6(%arg0: i32) -> (i32, i32) {
    %c0_i32 = arith.constant 0 : i32
    %c0_i32_0 = arith.constant 0 : i32
    %c0_i32_1 = arith.constant 0 : i32
    return %c0_i32, %c0_i32_0 : i32, i32
  }
  func.func @transform_7(%arg0: i32) -> (i32, i32, i32, i32) {
    %c0_i32 = arith.constant 0 : i32
    %c0_i32_0 = arith.constant 0 : i32
    %c0_i32_1 = arith.constant 0 : i32
    %c0_i32_2 = arith.constant 0 : i32
    return %arg0, %c0_i32, %c0_i32_0, %c0_i32_1 : i32, i32, i32, i32
  }
}

</mosaic_0001>

<bundles_post_ra>
// kernel: tpu_custom_call.1
= control target key start
LH: loop header
LB: loop body
LE: loop exit
PB: predicated region body
PF: predicated region fallthrough
CT: control target
= control target key end

     0   :  { %12 = vsyncpa [#allocation4], 0  ;;  %s1794_s0 = inlined_call_operand.hbm [shape: f32[2,16,16,32], index: 0, kind: input, shape index: {}]   ;;  %s1795_s1 = inlined_call_operand.vmem [shape: f32[2,32], index: 1, kind: input, shape index: {}]   ;;  %s1796_s2 = inlined_call_operand.vmem [shape: f32[2,1], index: 2, kind: input, shape index: {}]   ;;  %s1797_s3 = inlined_call_operand.vmem [shape: f32[2,32], index: 3, kind: input, shape index: {}]   ;;  %s1798_s4 = inlined_call_operand.vmem [shape: f32[1,32], index: 4, kind: input, shape index: {}]   ;;  %s1799_s5 = inlined_call_operand.vmem [shape: f32[9,32], index: 5, kind: input, shape index: {}]   ;;  %s1800_s6 = inlined_call_operand.vmem [shape: f32[1,32], index: 6, kind: input, shape index: {}]   ;;  %s1801_s7 = inlined_call_operand.hbm [shape: f32[2,8,8,32], index: 7, kind: output, shape index: {}]  }
   0x1   :  { %13 = vsyncpa [#allocation5], 0  ;;  %s1058_s24 = smov [#allocation3]   ;;  %s1010_s28 = scalar_lea.hbm %s1794_s0, 8192 }
   0x2   :  { %s19_s25 = sshll.u32 %s1058_s24, 4  ;;  %p1011_p0 = scmp.ne.s32.totalorder %s1794_s0, %s1010_s28  ;;  %s20_s25 = int_to_ptr.vmem [resolvable:$true] %s19_s25 }
   0x3   :  { %p1014_p1 = scmp.lt.u32.totalorder %s1010_s28, %s1794_s0 }
   0x5   :  { %p1016_p2 = pnand %p1014_p1, %p1011_p0 }
   0x7   :  { %1019 = shalt.err (!%p1016_p2)
}
   0x8   :  { %s1020_s10 = scalar_lea.vmem %s20_s25, 8192  ;;  %p1025_p4 = scmp.lt.s32.totalorder %s20_s25, %s20_s25 }
   0x9   :  { %p1021_p3 = scmp.ne.s32.totalorder %s20_s25, %s1020_s10  ;;  %p1026_p5 = scmp.lt.s32.totalorder %s1020_s10, %s1020_s10 }
   0xb   :  { %p1027_p6 = por %p1026_p5, %p1025_p4 }
   0xd   :  { %p1028_p7 = pnand %p1027_p6, %p1021_p3 }
   0xf   :  { %1031 = shalt.err (!%p1028_p7)
}
  0x10   :  { %s1059_s11 = smov 128   ;;  %s1060_s12 = smov 8  }
  0x11   :  { %25 = dma.hbm_to_vmem [thread:$0]  %s1794_s0, 8192, %s20_s25, [#allocation4], %s1059_s11, %s1059_s11, %s1060_s12  }
  0x12   :  { %1054 = dma.done.wait [#allocation4], 8192  }
  0x13   :  { %1055 = vsyncadd [#allocation4], 4294959104  ;;  %v170_v0 = vlaneseq  ;;  %v1127_v9 = vld [vmem:[#allocation3] ss:$2 sm:$0xff]  ;;  %v1129_v17 = vld [vmem:[#allocation3 + $0x1] ss:$2 sm:$0xff] }
  0x14   :  { %1823 = vst [vmem:[#allocation10_spill] sm:$0xff] %v1127_v9  ;;  %v43_v10 = vld [vmem:[#allocation3 + $0x20] ss:$2 sm:$0xff]  ;;  %v1131_v18 = vld [vmem:[#allocation3 + $0x21] ss:$2 sm:$0xff]  ;;  %v596_v21 = vadd.f32 %v1129_v17, %v1127_v9  ;;  %vm321_vm0 = vcmask 261120  }
  0x15   :  { %v1118_v1 = vshrl.u32 %v170_v0, 7  ;;  %v45_v11 = vld [vmem:[#allocation3 + $0x40] ss:$2 sm:$0xff]  ;;  %v1133_v19 = vld [vmem:[#allocation3 + $0x41] ss:$2 sm:$0xff]  ;;  %v597_v25 = vadd.f32 %v1131_v18, %v43_v10  ;;  %vm426_vm1 = vcmask 260096  }
  0x16   :  { %v47_v12 = vld [vmem:[#allocation3 + $0x60] ss:$2 sm:$0xff]  ;;  %v1135_v20 = vld [vmem:[#allocation3 + $0x61] ss:$2 sm:$0xff]  ;;  %v598_v26 = vadd.f32 %v1133_v19, %v45_v11  ;;  %v1150_v29 = vld [vmem:[#allocation3 + $0x10] ss:$2 sm:$0xff] }
  0x17   :  { %1822 = vst [vmem:[#allocation9_spill] sm:$0xff] %v1118_v1  ;;  %v172_v2 = vsub.s32 4, %v1118_v1  ;;  %v192_v3 = vsub.s32 5, %v1118_v1  ;;  %v228_v4 = vsub.s32 7, %v1118_v1  ;;  %v356_v5 = vsub.s32 3, %v1118_v1  ;;  %v1200_v57 = vld [vmem:[%s1799_s5] sm:$0xff] }
  0x18   :  { %v49_v13 = vld [vmem:[#allocation3 + $0x80] ss:$2 sm:$0xff]  ;;  %v1139_v22 = vld [vmem:[#allocation3 + $0x81] ss:$2 sm:$0xff]  ;;  %v599_v27 = vadd.f32 %v1135_v20, %v47_v12  ;;  %v1152_v30 = vld [vmem:[#allocation3 + $0x30] ss:$2 sm:$0xff]  ;;  %v612_v38 = vadd.f32 %v596_v21, %v1150_v29 }
  0x19   :  { %v51_v14 = vld [vmem:[#allocation3 + $0xa0] ss:$2 sm:$0xff]  ;;  %v1141_v23 = vld [vmem:[#allocation3 + $0xa1] ss:$2 sm:$0xff]  ;;  %v600_v31 = vadd.f32 %v1139_v22, %v49_v13  ;;  %v1157_v34 = vld [vmem:[#allocation3 + $0x50] ss:$2 sm:$0xff]  ;;  %v613_v39 = vadd.f32 %v597_v25, %v1152_v30  ;;  %v1220_v63 = vrot.slane %v1200_v57, %v172_v2  ;;  %v1223_v0 = vrot.slane %v1200_v57, %v192_v3 }
  0x1a   :  { %v53_v15 = vld [vmem:[#allocation3 + $0xc0] ss:$2 sm:$0xff]  ;;  %v1143_v24 = vld [vmem:[#allocation3 + $0xc1] ss:$2 sm:$0xff]  ;;  %v601_v32 = vadd.f32 %v1141_v23, %v51_v14  ;;  %v1159_v35 = vld [vmem:[#allocation3 + $0x70] ss:$2 sm:$0xff]  ;;  %v614_v43 = vadd.f32 %v598_v26, %v1157_v34  ;;  %v1226_v21 = vrot.slane %v1200_v57, %v228_v4  ;;  %v1229_v25 = vrot.slane %v1200_v57, %v356_v5 }
  0x1b   :  { %v55_v16 = vld [vmem:[#allocation3 + $0xe0] ss:$2 sm:$0xff]  ;;  %v1148_v28 = vld [vmem:[#allocation3 + $0xe1] ss:$2 sm:$0xff]  ;;  %v602_v33 = vadd.f32 %v1143_v24, %v53_v15  ;;  %v1161_v36 = vld [vmem:[#allocation3 + $0x90] ss:$2 sm:$0xff]  ;;  %v615_v44 = vadd.f32 %v599_v27, %v1159_v35  ;;  %v176_v4 = vmul.f32 %v1220_v63, %v45_v11  ;;  %v177_v5 = vmul.f32 %v1220_v63, %v47_v12 }
  0x1c   :  { %v603_v37 = vadd.f32 %v1148_v28, %v55_v16  ;;  %v1166_v40 = vld [vmem:[#allocation3 + $0xb0] ss:$2 sm:$0xff]  ;;  %v616_v45 = vadd.f32 %v600_v31, %v1161_v36  ;;  %v1173_v46 = vld [vmem:[#allocation3 + $0x11] ss:$2 sm:$0xff]  ;;  %1830 = vst [vmem:[#allocation17_spill] sm:$0xff] %v1200_v57  ;;  %1831 = vst [vmem:[#allocation18_spill] sm:$0xff] %v1220_v63  ;;  %v175_v31 = vmul.f32 %v1220_v63, %v43_v10 }
  0x1d   :  { %v1168_v41 = vld [vmem:[#allocation3 + $0xd0] ss:$2 sm:$0xff]  ;;  %1824 = vst [vmem:[#allocation11_spill] sm:$0xff] %v1173_v46  ;;  %v1175_v47 = vld [vmem:[#allocation3 + $0x31] ss:$2 sm:$0xff]  ;;  %v617_v49 = vadd.f32 %v601_v32, %v1166_v40  ;;  %v1192_v55 = vadd.f32 %v612_v38, %v1173_v46  ;;  %1832 = vst [vmem:[#allocation19_spill] sm:$0xff] %v1223_v0  ;;  %v178_v32 = vmul.f32 %v1220_v63, %v49_v13 }
  0x1e   :  { %v119_v42 = vld [vmem:[#allocation3 + $0xf0] ss:$2 sm:$0xff]  ;;  %1825 = vst [vmem:[#allocation12_spill] sm:$0xff] %v1175_v47  ;;  %v1177_v48 = vld [vmem:[#allocation3 + $0x51] ss:$2 sm:$0xff]  ;;  %v1187_v53 = vadd.f32 %v602_v33, %v1168_v41  ;;  %v1195_v56 = vadd.f32 %v613_v39, %v1175_v47  ;;  %v179_v33 = vmul.f32 %v1220_v63, %v51_v14  ;;  %v181_v38 = vmul.f32 %v1220_v63, %v55_v16 }
  0x1f   :  { %1826 = vst [vmem:[#allocation13_spill] sm:$0xff] %v1177_v48  ;;  %v1180_v50 = vld [vmem:[#allocation3 + $0x71] ss:$2 sm:$0xff]  ;;  %v1189_v54 = vadd.f32 %v603_v37, %v119_v42  ;;  %v1203_v58 = vadd.f32 %v614_v43, %v1177_v48  ;;  %v1217_v62 = vld [vmem:[%s1799_s5 + $0x8] ss:$0 sm:$0xff]  ;;  %v180_v37 = vmul.f32 %v1220_v63, %v53_v15  ;;  %v1250_v39 = vmul.f32 %v1223_v0, %v1129_v17 }
  0x20   :  { %1827 = vst [vmem:[#allocation14_spill] sm:$0xff] %v1180_v50  ;;  %v1182_v51 = vld [vmem:[#allocation3 + $0x91] ss:$2 sm:$0xff]  ;;  %v1206_v59 = vadd.f32 %v615_v44, %v1180_v50  ;;  %v1233_v26 = vmul.f32 %v1217_v62, %v1173_v46  ;;  %v267_v27 = vmul.f32 %v1217_v62, %v1175_v47  ;;  %v268_v2 = vmul.f32 %v1217_v62, %v1177_v48 }
  0x21   :  { %1828 = vst [vmem:[#allocation15_spill] sm:$0xff] %v1182_v51  ;;  %v1184_v52 = vld [vmem:[#allocation3 + $0xb1] ss:$2 sm:$0xff]  ;;  %v1209_v60 = vadd.f32 %v616_v45, %v1182_v51  ;;  %v269_v3 = vmul.f32 %v1217_v62, %v1180_v50  ;;  %1834 = vst [vmem:[#allocation21_spill] sm:$0xff] %v1250_v39  ;;  %v195_v43 = vmul.f32 %v1223_v0, %v1131_v18  ;;  %vm695_vm2 = vcmask 254976  }
  0x22   :  { %1829 = vst [vmem:[#allocation16_spill] sm:$0xff] %v1184_v52  ;;  %v1212_v61 = vadd.f32 %v617_v49, %v1184_v52  ;;  %1833 = vst [vmem:[#allocation20_spill] sm:$0xff] %v1233_v26  ;;  %v196_v10 = vmul.f32 %v1223_v0, %v1133_v19  ;;  %v197_v11 = vmul.f32 %v1223_v0, %v1135_v20 }
  0x23   :  { %v198_v12 = vmul.f32 %v1223_v0, %v1139_v22  ;;  %v199_v13 = vmul.f32 %v1223_v0, %v1141_v23  ;;  %v200_v14 = vmul.f32 %v1223_v0, %v1143_v24  ;;  %v201_v15 = vmul.f32 %v1223_v0, %v1148_v28 }
  0x24   :  { %v1268_v16 = vmul.f32 %v1226_v21, %v1150_v29  ;;  %v211_v44 = vadd.f32 %v195_v43, %v175_v31  ;;  %v212_v45 = vadd.f32 %v196_v10, %v176_v4  ;;  %v213_v49 = vadd.f32 %v197_v11, %v177_v5 }
  0x25   :  { %v214_v8 = vadd.f32 %v198_v12, %v178_v32  ;;  %v215_v7 = vadd.f32 %v199_v13, %v179_v33  ;;  %v216_v6 = vadd.f32 %v200_v14, %v180_v37  ;;  %v217_v26 = vadd.f32 %v201_v15, %v181_v38  ;;  %v1285_v37 = vld [vmem:[#allocation3 + $0xd1] ss:$2 sm:$0xff] }
  0x26   :  { %1835 = vst [vmem:[#allocation22_spill] sm:$0xff] %v1268_v16  ;;  %v231_v39 = vmul.f32 %v1226_v21, %v1152_v30  ;;  %v232_v63 = vmul.f32 %v1226_v21, %v1157_v34  ;;  %v233_v0 = vmul.f32 %v1226_v21, %v1159_v35  ;;  %v234_v16 = vmul.f32 %v1226_v21, %v1161_v36  ;;  %v151_v12 = vld [vmem:[#allocation3 + $0xf1] ss:$2 sm:$0xff] }
  0x27   :  { %v235_v31 = vmul.f32 %v1226_v21, %v1166_v40  ;;  %v236_v4 = vmul.f32 %v1226_v21, %v1168_v41  ;;  %v237_v5 = vmul.f32 %v1226_v21, %v119_v42  ;;  %v270_v33 = vmul.f32 %v1217_v62, %v1182_v51  ;;  %1836 = vst [vmem:[#allocation23_spill] sm:$0xff] %v1285_v37  ;;  %v1294_v42 = vld [vmem:[%s1800_s6] ss:$0 sm:$0xff] }
  0x28   :  { %v247_v32 = vadd.f32 %v231_v39, %v211_v44  ;;  %v248_v38 = vadd.f32 %v232_v63, %v212_v45  ;;  %v249_v43 = vadd.f32 %v233_v0, %v213_v49  ;;  %v250_v10 = vadd.f32 %v234_v16, %v214_v8 }
  0x29   :  { %v251_v11 = vadd.f32 %v235_v31, %v215_v7  ;;  %v252_v13 = vadd.f32 %v236_v4, %v216_v6  ;;  %v253_v14 = vadd.f32 %v237_v5, %v217_v26  ;;  %v271_v15 = vmul.f32 %v1217_v62, %v1184_v52 }
  0x2a   :  { %v272_v9 = vmul.f32 %v1217_v62, %v1285_v37  ;;  %v273_v39 = vmul.f32 %v1217_v62, %v151_v12  ;;  %v283_v63 = vadd.f32 %v267_v27, %v247_v32  ;;  %v284_v0 = vadd.f32 %v268_v2, %v248_v38 }
  0x2b   :  { %v285_v8 = vadd.f32 %v269_v3, %v249_v43  ;;  %v286_v7 = vadd.f32 %v270_v33, %v250_v10  ;;  %v287_v16 = vadd.f32 %v271_v15, %v251_v11  ;;  %v358_v26 = vmul.f32 %v1229_v25, %v1129_v17 }
  0x2c   :  { %v288_v6 = vadd.f32 %v272_v9, %v252_v13  ;;  %v289_v44 = vadd.f32 %v273_v39, %v253_v14  ;;  %v306_v45 = vadd.f32 %v1294_v42, %v283_v63  ;;  %v307_v49 = vadd.f32 %v1294_v42, %v284_v0 }
  0x2d   :  { %v308_v31 = vadd.f32 %v1294_v42, %v285_v8  ;;  %v309_v4 = vadd.f32 %v1294_v42, %v286_v7  ;;  %v310_v5 = vadd.f32 %v1294_v42, %v287_v16  ;;  %v359_v2 = vmul.f32 %v1229_v25, %v1131_v18 }
  0x2e   :  { %v311_v27 = vadd.f32 %v1294_v42, %v288_v6  ;;  %v312_v9 = vadd.f32 %v1294_v42, %v289_v44  ;;  %323 = vst.msk [vmem:[#allocation2 + $0x8] sm:$0xff] %vm321_vm0, %v306_v45  ;;  %324 = vst.msk [vmem:[#allocation2 + $0x10] sm:$0xff] %vm321_vm0, %v307_v49  ;;  %v360_v17 = vmul.f32 %v1229_v25, %v1133_v19 }
  0x2f   :  { %325 = vst.msk [vmem:[#allocation2 + $0x18] sm:$0xff] %vm321_vm0, %v308_v31  ;;  %v361_v3 = vmul.f32 %v1229_v25, %v1135_v20  ;;  %v362_v32 = vmul.f32 %v1229_v25, %v1139_v22  ;;  %326 = vst.msk [vmem:[#allocation2 + $0x20] sm:$0xff] %vm321_vm0, %v309_v4  ;;  %v363_v18 = vmul.f32 %v1229_v25, %v1141_v23  ;;  %v1837_v20 = vsub.s32 6, %v1118_v1 }
  0x30   :  { %327 = vst.msk [vmem:[#allocation2 + $0x28] sm:$0xff] %vm321_vm0, %v310_v5  ;;  %328 = vst.msk [vmem:[#allocation2 + $0x30] sm:$0xff] %vm321_vm0, %v311_v27  ;;  %v364_v33 = vmul.f32 %v1229_v25, %v1143_v24  ;;  %v365_v19 = vmul.f32 %v1229_v25, %v1148_v28  ;;  %v1838_v22 = vsub.s32 1, %v1118_v1  ;;  %v1839_v23 = vsub.s32 2, %v1118_v1 }
  0x31   :  { %v1329_v38 = vrot.slane %v1200_v57, %v1837_v20  ;;  %329 = vst.msk [vmem:[#allocation2 + $0x38] sm:$0xff] %vm321_vm0, %v312_v9  ;;  %v1344_v24 = vadd.f32 %v1187_v53, %v1285_v37  ;;  %v1347_v28 = vadd.f32 %v1189_v54, %v151_v12 }
  0x32   :  { %v1335_v43 = vrot.slane %v1200_v57, %v1838_v22  ;;  %v1340_v10 = vrot.slane %v1200_v57, %v1839_v23  ;;  %v1542_v57 = vld [vmem:[#allocation3 + $0x191] ss:$2 sm:$0xff] }
  0x33   :  { %v378_v11 = vmul.f32 %v1329_v38, %v1173_v46  ;;  %v379_v13 = vmul.f32 %v1329_v38, %v1175_v47  ;;  %v380_v14 = vmul.f32 %v1329_v38, %v1177_v48  ;;  %v381_v15 = vmul.f32 %v1329_v38, %v1180_v50 }
  0x34   :  { %v382_v39 = vmul.f32 %v1329_v38, %v1182_v51  ;;  %v383_v53 = vmul.f32 %v1329_v38, %v1184_v52  ;;  %v384_v54 = vmul.f32 %v1329_v38, %v1285_v37  ;;  %v385_v63 = vmul.f32 %v1329_v38, %v151_v12 }
  0x35   :  { %v1364_v0 = vadd.f32 %v378_v11, %v358_v26  ;;  %v395_v8 = vadd.f32 %v379_v13, %v359_v2  ;;  %v396_v7 = vadd.f32 %v380_v14, %v360_v17  ;;  %v397_v16 = vadd.f32 %v381_v15, %v361_v3  ;;  %v339_v31 = vld [vmem:[#allocation2 + $0x9] sm:$0x7f]  ;;  %v340_v4 = vld [vmem:[#allocation2 + $0x11] sm:$0x7f] }
  0x36   :  { %v398_v6 = vadd.f32 %v382_v39, %v362_v32  ;;  %v399_v44 = vadd.f32 %v383_v53, %v363_v18  ;;  %v400_v45 = vadd.f32 %v384_v54, %v364_v33  ;;  %v401_v49 = vadd.f32 %v385_v63, %v365_v19  ;;  %v341_v5 = vld [vmem:[#allocation2 + $0x19] sm:$0x7f]  ;;  %v342_v2 = vld [vmem:[#allocation2 + $0x21] sm:$0x7f] }
  0x37   :  { %v462_v27 = vmul.f32 %v1335_v43, %v1150_v29  ;;  %v463_v9 = vmul.f32 %v1335_v43, %v1152_v30  ;;  %v464_v12 = vmul.f32 %v1335_v43, %v1157_v34  ;;  %v465_v26 = vmul.f32 %v1335_v43, %v1159_v35  ;;  %v343_v17 = vld [vmem:[#allocation2 + $0x29] sm:$0x7f]  ;;  %v344_v3 = vld [vmem:[#allocation2 + $0x31] sm:$0x7f] }
  0x38   :  { %v411_v32 = vadd.f32 %v395_v8, %v339_v31  ;;  %v412_v18 = vadd.f32 %v396_v7, %v340_v4  ;;  %v413_v33 = vadd.f32 %v397_v16, %v341_v5  ;;  %v466_v19 = vmul.f32 %v1335_v43, %v1161_v36  ;;  %v345_v20 = vld [vmem:[#allocation2 + $0x39] sm:$0x7f]  ;;  %v1411_v4 = vld [vmem:[#allocation3 + $0x120] ss:$2 sm:$0xff] }
  0x39   :  { %v414_v29 = vadd.f32 %v398_v6, %v342_v2  ;;  %v415_v22 = vadd.f32 %v399_v44, %v343_v17  ;;  %v416_v23 = vadd.f32 %v400_v45, %v344_v3  ;;  %v467_v30 = vmul.f32 %v1335_v43, %v1166_v40  ;;  %v1403_v6 = vld [vmem:[#allocation3 + $0x100] ss:$2 sm:$0xff] }
  0x3a   :  { %v417_v34 = vadd.f32 %v401_v49, %v345_v20  ;;  %428 = vst.msk [vmem:[#allocation2 + $0x9] sm:$0x7f] %vm426_vm1, %v411_v32  ;;  %429 = vst.msk [vmem:[#allocation2 + $0x11] sm:$0x7f] %vm426_vm1, %v412_v18  ;;  %v468_v35 = vmul.f32 %v1335_v43, %v1168_v41  ;;  %v480_v36 = vmul.f32 %v1340_v10, %v1173_v46  ;;  %v644_v54 = vsel %vm321_vm0, %v1192_v55, 0.0 }
  0x3b   :  { %430 = vst.msk [vmem:[#allocation2 + $0x19] sm:$0x7f] %vm426_vm1, %v413_v33  ;;  %v481_v11 = vmul.f32 %v1340_v10, %v1175_v47  ;;  %431 = vst.msk [vmem:[#allocation2 + $0x21] sm:$0x7f] %vm426_vm1, %v414_v29  ;;  %v482_v40 = vmul.f32 %v1340_v10, %v1177_v48  ;;  %v483_v13 = vmul.f32 %v1340_v10, %v1180_v50  ;;  %v645_v45 = vsel %vm321_vm0, %v1195_v56, 0.0 }
  0x3c   :  { %432 = vst.msk [vmem:[#allocation2 + $0x29] sm:$0x7f] %vm426_vm1, %v415_v22  ;;  %433 = vst.msk [vmem:[#allocation2 + $0x31] sm:$0x7f] %vm426_vm1, %v416_v23  ;;  %v484_v41 = vmul.f32 %v1340_v10, %v1182_v51  ;;  %v485_v14 = vmul.f32 %v1340_v10, %v1184_v52  ;;  %v486_v15 = vmul.f32 %v1340_v10, %v1285_v37  ;;  %v647_v49 = vsel %vm321_vm0, %v1203_v58, 0.0 }
  0x3d   :  { %434 = vst.msk [vmem:[#allocation2 + $0x39] sm:$0x7f] %vm426_vm1, %v417_v34  ;;  %v494_v39 = vadd.f32 %v480_v36, %v462_v27  ;;  %v495_v53 = vadd.f32 %v481_v11, %v463_v9  ;;  %v496_v63 = vadd.f32 %v482_v40, %v464_v12  ;;  %v497_v8 = vadd.f32 %v483_v13, %v465_v26  ;;  %v1421_v56 = vld [vmem:[#allocation3 + $0x140] ss:$2 sm:$0xff]  ;;  %v1504_v37 = vld [vmem:[#allocation3 + $0x150] ss:$2 sm:$0xff] }
  0x3e   :  { %v498_v7 = vadd.f32 %v484_v41, %v466_v19  ;;  %v499_v16 = vadd.f32 %v485_v14, %v467_v30  ;;  %v500_v44 = vadd.f32 %v486_v15, %v468_v35  ;;  %v649_v31 = vsel %vm321_vm0, %v1206_v59, 0.0  ;;  %v1840_v59 = vld [vmem:[#allocation10_spill] sm:$0xff]  ;;  %v1844_v35 = vld [vmem:[#allocation21_spill] sm:$0xff]  ;;  %v1506_v52 = vld [vmem:[#allocation3 + $0x170] ss:$2 sm:$0xff] }
  0x3f   :  { %v646_v5 = vadd.f32 %v645_v45, %v644_v54  ;;  %v651_v55 = vsel %vm321_vm0, %v1209_v60, 0.0  ;;  %v653_v27 = vsel %vm321_vm0, %v1212_v61, 0.0  ;;  %v1419_v9 = vsel %vm321_vm0, %v1344_v24, 0.0  ;;  %v1841_v12 = vld [vmem:[#allocation18_spill] sm:$0xff]  ;;  %v1538_v51 = vld [vmem:[#allocation3 + $0x151] ss:$2 sm:$0xff] }
  0x40   :  { %v1425_v58 = vsel %vm321_vm0, %v1347_v28, 0.0  ;;  %v174_v26 = vmul.f32 %v1841_v12, %v1840_v59  ;;  %v1429_v2 = vld [vmem:[#allocation3 + $0x160] ss:$2 sm:$0xff]  ;;  %v182_v60 = vmul.f32 %v1841_v12, %v1403_v6  ;;  %v183_v61 = vmul.f32 %v1841_v12, %v1411_v4  ;;  %v1469_v59 = vld [vmem:[#allocation3 + $0x181] ss:$2 sm:$0xff] }
  0x41   :  { %1842 = vst [vmem:[#allocation10_spill] sm:$0xff] %v1429_v2  ;;  %v1431_v17 = vld [vmem:[#allocation3 + $0x180] ss:$2 sm:$0xff]  ;;  %v445_v3 = vld [vmem:[#allocation2 + $0x10] sm:$0xff]  ;;  %v648_v18 = vadd.f32 %v647_v49, %v646_v5  ;;  %v184_v28 = vmul.f32 %v1841_v12, %v1421_v56  ;;  %v185_v33 = vmul.f32 %v1841_v12, %v1429_v2  ;;  %v1454_v49 = vld [vmem:[#allocation3 + $0x101] ss:$2 sm:$0xff] }
  0x42   :  { %1843 = vst [vmem:[#allocation18_spill] sm:$0xff] %v1431_v17  ;;  %v444_v24 = vld [vmem:[#allocation2 + $0x8] sm:$0xff]  ;;  %v446_v32 = vld [vmem:[#allocation2 + $0x18] sm:$0xff]  ;;  %v186_v19 = vmul.f32 %v1841_v12, %v1431_v17  ;;  %v447_v20 = vld [vmem:[#allocation2 + $0x20] sm:$0xff]  ;;  %v509_v30 = vadd.f32 %v495_v53, %v445_v3  ;;  %v210_v36 = vadd.f32 %v1844_v35, %v174_v26 }
  0x43   :  { %v448_v29 = vld [vmem:[#allocation2 + $0x28] sm:$0xff]  ;;  %v449_v22 = vld [vmem:[#allocation2 + $0x30] sm:$0xff]  ;;  %v508_v23 = vadd.f32 %v494_v39, %v444_v24  ;;  %v510_v34 = vadd.f32 %v496_v63, %v446_v32  ;;  %v511_v40 = vadd.f32 %v497_v8, %v447_v20  ;;  %v650_v14 = vadd.f32 %v649_v31, %v648_v18  ;;  %v1850_v18 = vld [vmem:[#allocation20_spill] sm:$0xff] }
  0x44   :  { %v450_v11 = vld [vmem:[#allocation2 + $0x38] sm:$0xff]  ;;  %v512_v13 = vadd.f32 %v498_v7, %v448_v29  ;;  %v513_v41 = vadd.f32 %v499_v16, %v449_v22  ;;  %v1444_v15 = vld [vmem:[#allocation3 + $0x1a0] ss:$2 sm:$0xff]  ;;  %523 = vst.msk [vmem:[#allocation2 + $0x10] sm:$0xff] %vm321_vm0, %v509_v30  ;;  %v1456_v8 = vld [vmem:[#allocation3 + $0x121] ss:$2 sm:$0xff] }
  0x45   :  { %1845 = vst [vmem:[#allocation21_spill] sm:$0xff] %v1444_v15  ;;  %v1446_v54 = vld [vmem:[#allocation3 + $0x1c0] ss:$2 sm:$0xff]  ;;  %v514_v45 = vadd.f32 %v500_v44, %v450_v11  ;;  %522 = vst.msk [vmem:[#allocation2 + $0x8] sm:$0xff] %vm321_vm0, %v508_v23  ;;  %v187_v7 = vmul.f32 %v1841_v12, %v1444_v15  ;;  %v652_v44 = vadd.f32 %v651_v55, %v650_v14  ;;  %v1465_v31 = vld [vmem:[#allocation3 + $0x141] ss:$2 sm:$0xff] }
  0x46   :  { %1846 = vst [vmem:[#allocation24_spill] sm:$0xff] %v1446_v54  ;;  %524 = vst.msk [vmem:[#allocation2 + $0x18] sm:$0xff] %vm321_vm0, %v510_v34  ;;  %v1847_v39 = vld [vmem:[#allocation22_spill] sm:$0xff]  ;;  %v188_v16 = vmul.f32 %v1841_v12, %v1446_v54  ;;  %v1849_v24 = vld [vmem:[#allocation19_spill] sm:$0xff] }
  0x47   :  { %v246_v53 = vadd.f32 %v1847_v39, %v210_v36  ;;  %v1452_v63 = vld [vmem:[#allocation3 + $0x1e0] ss:$2 sm:$0xff]  ;;  %525 = vst.msk [vmem:[#allocation2 + $0x20] sm:$0xff] %vm321_vm0, %v511_v40  ;;  %526 = vst.msk [vmem:[#allocation2 + $0x28] sm:$0xff] %vm321_vm0, %v512_v13  ;;  %v1467_v5 = vld [vmem:[#allocation3 + $0x161] ss:$2 sm:$0xff]  ;;  %v202_v3 = vmul.f32 %v1849_v24, %v1454_v49  ;;  %v203_v32 = vmul.f32 %v1849_v24, %v1456_v8 }
  0x48   :  { %1848 = vst [vmem:[#allocation22_spill] sm:$0xff] %v1452_v63  ;;  %527 = vst.msk [vmem:[#allocation2 + $0x30] sm:$0xff] %vm321_vm0, %v513_v41  ;;  %v189_v26 = vmul.f32 %v1841_v12, %v1452_v63  ;;  %v1479_v55 = vld [vmem:[#allocation3 + $0x1a1] ss:$2 sm:$0xff]  ;;  %v204_v23 = vmul.f32 %v1849_v24, %v1465_v31  ;;  %v205_v12 = vmul.f32 %v1849_v24, %v1467_v5  ;;  %v1499_v39 = vld [vmem:[#allocation3 + $0x110] ss:$2 sm:$0xff] }
  0x49   :  { %528 = vst.msk [vmem:[#allocation2 + $0x38] sm:$0xff] %vm321_vm0, %v514_v45  ;;  %v282_v20 = vadd.f32 %v1850_v18, %v246_v53  ;;  %v1481_v29 = vld [vmem:[#allocation3 + $0x1c1] ss:$2 sm:$0xff]  ;;  %v206_v30 = vmul.f32 %v1849_v24, %v1469_v59  ;;  %v654_v34 = vadd.f32 %v653_v27, %v652_v44  ;;  %v207_v35 = vmul.f32 %v1849_v24, %v1479_v55  ;;  %v1501_v53 = vld [vmem:[#allocation3 + $0x130] ss:$2 sm:$0xff] }
  0x4a   :  { %v1483_v22 = vld [vmem:[#allocation3 + $0x1e1] ss:$2 sm:$0xff]  ;;  %v208_v36 = vmul.f32 %v1849_v24, %v1481_v29  ;;  %v218_v13 = vadd.f32 %v202_v3, %v182_v60  ;;  %v219_v41 = vadd.f32 %v203_v32, %v183_v61  ;;  %v220_v14 = vadd.f32 %v204_v23, %v184_v28  ;;  %v1519_v3 = vld [vmem:[#allocation3 + $0x1f0] ss:$2 sm:$0xff]  ;;  %v1540_v46 = vld [vmem:[#allocation3 + $0x171] ss:$2 sm:$0xff] }
  0x4b   :  { %v209_v11 = vmul.f32 %v1849_v24, %v1483_v22  ;;  %v305_v40 = vadd.f32 %v1294_v42, %v282_v20  ;;  %v656_v45 = vadd.f32 %v1419_v9, %v654_v34  ;;  %v221_v27 = vadd.f32 %v205_v12, %v185_v33  ;;  %v1508_v24 = vld [vmem:[#allocation3 + $0x190] ss:$2 sm:$0xff]  ;;  %1851 = vst [vmem:[#allocation19_spill] sm:$0xff] %v1519_v3  ;;  %v1534_v34 = vld [vmem:[#allocation3 + $0x111] ss:$2 sm:$0xff] }
  0x4c   :  { %v222_v44 = vadd.f32 %v206_v30, %v186_v19  ;;  %v223_v18 = vadd.f32 %v207_v35, %v187_v7  ;;  %v224_v60 = vadd.f32 %v208_v36, %v188_v16  ;;  %v238_v9 = vmul.f32 %v1226_v21, %v1499_v39  ;;  %v1515_v19 = vld [vmem:[#allocation3 + $0x1b0] ss:$2 sm:$0xff] }
  0x4d   :  { %322 = vst.msk [vmem:[#allocation2] sm:$0xff] %vm321_vm0, %v305_v40  ;;  %v225_v61 = vadd.f32 %v209_v11, %v189_v26  ;;  %v239_v28 = vmul.f32 %v1226_v21, %v1501_v53  ;;  %v658_v33 = vadd.f32 %v1425_v58, %v656_v45  ;;  %v1517_v7 = vld [vmem:[#allocation3 + $0x1d0] ss:$2 sm:$0xff]  ;;  %v240_v32 = vmul.f32 %v1226_v21, %v1504_v37  ;;  %v1536_v45 = vld [vmem:[#allocation3 + $0x131] ss:$2 sm:$0xff] }
  0x4e   :  { %v241_v16 = vmul.f32 %v1226_v21, %v1506_v52  ;;  %v242_v26 = vmul.f32 %v1226_v21, %v1508_v24  ;;  %v243_v20 = vmul.f32 %v1226_v21, %v1515_v19  ;;  %v244_v58 = vmul.f32 %v1226_v21, %v1517_v7 }
  0x4f   :  { %v245_v23 = vmul.f32 %v1226_v21, %v1519_v3  ;;  %v254_v12 = vadd.f32 %v238_v9, %v218_v13  ;;  %v674_v30 = vsel %vm321_vm0, %v658_v33, 0.0  ;;  %v255_v35 = vadd.f32 %v239_v28, %v219_v41  ;;  %v1544_v21 = vld [vmem:[#allocation3 + $0x1b1] ss:$2 sm:$0xff] }
  0x50   :  { %v256_v36 = vadd.f32 %v240_v32, %v220_v14  ;;  %v257_v11 = vadd.f32 %v241_v16, %v221_v27  ;;  %v675_v40 = vrot.slane %v674_v30, 4  ;;  %v258_v50 = vadd.f32 %v242_v26, %v222_v44  ;;  %v1552_v44 = vld [vmem:[#allocation3 + $0x1d1] ss:$2 sm:$0xff] }
  0x51   :  { %v259_v48 = vadd.f32 %v243_v20, %v223_v18  ;;  %v260_v47 = vadd.f32 %v244_v58, %v224_v60  ;;  %v261_v13 = vadd.f32 %v245_v23, %v225_v61  ;;  %v274_v41 = vmul.f32 %v1217_v62, %v1534_v34  ;;  %v1554_v18 = vld [vmem:[#allocation3 + $0x1f1] ss:$2 sm:$0xff] }
  0x52   :  { %v275_v14 = vmul.f32 %v1217_v62, %v1536_v45  ;;  %v276_v27 = vmul.f32 %v1217_v62, %v1538_v51  ;;  %v676_v9 = vadd.f32 %v675_v40, %v674_v30  ;;  %v277_v60 = vmul.f32 %v1217_v62, %v1540_v46 }
  0x53   :  { %v278_v61 = vmul.f32 %v1217_v62, %v1542_v57  ;;  %v279_v28 = vmul.f32 %v1217_v62, %v1544_v21  ;;  %v280_v32 = vmul.f32 %v1217_v62, %v1552_v44  ;;  %v281_v16 = vmul.f32 %v1217_v62, %v1554_v18 }
  0x54   :  { %v338_v33 = vld [vmem:[#allocation2 + $0x1] sm:$0x7f]  ;;  %v290_v26 = vadd.f32 %v274_v41, %v254_v12  ;;  %v291_v20 = vadd.f32 %v275_v14, %v255_v35  ;;  %v677_v58 = vrot.slane %v676_v9, 2  ;;  %v292_v30 = vadd.f32 %v276_v27, %v256_v36 }
  0x55   :  { %v410_v23 = vadd.f32 %v1364_v0, %v338_v33  ;;  %v293_v40 = vadd.f32 %v277_v60, %v257_v11  ;;  %v294_v1 = vadd.f32 %v278_v61, %v258_v50  ;;  %v295_v3 = vadd.f32 %v279_v28, %v259_v48  ;;  %v1605_v41 = vld [vmem:[%s1795_s1] sm:$0x3] }
  0x56   :  { %v296_v63 = vadd.f32 %v280_v32, %v260_v47  ;;  %v297_v54 = vadd.f32 %v281_v16, %v261_v13  ;;  %v678_v15 = vadd.f32 %v677_v58, %v676_v9  ;;  %v313_v17 = vadd.f32 %v1294_v42, %v290_v26 }
  0x57   :  { %427 = vst.msk [vmem:[#allocation2 + $0x1] sm:$0x7f] %vm426_vm1, %v410_v23  ;;  %v314_v2 = vadd.f32 %v1294_v42, %v291_v20  ;;  %v315_v62 = vadd.f32 %v1294_v42, %v292_v30  ;;  %v316_v12 = vadd.f32 %v1294_v42, %v293_v40  ;;  %v317_v0 = vadd.f32 %v1294_v42, %v294_v1 }
  0x58   :  { %v318_v35 = vadd.f32 %v1294_v42, %v295_v3  ;;  %v319_v50 = vadd.f32 %v1294_v42, %v296_v63  ;;  %v679_v48 = vrot.slane %v678_v15, 1  ;;  %v320_v47 = vadd.f32 %v1294_v42, %v297_v54  ;;  %330 = vst.msk [vmem:[#allocation2 + $0x40] sm:$0xff] %vm321_vm0, %v313_v17 }
  0x59   :  { %331 = vst.msk [vmem:[#allocation2 + $0x48] sm:$0xff] %vm321_vm0, %v314_v2  ;;  %332 = vst.msk [vmem:[#allocation2 + $0x50] sm:$0xff] %vm321_vm0, %v315_v62  ;;  %v366_v36 = vmul.f32 %v1229_v25, %v1454_v49  ;;  %v367_v11 = vmul.f32 %v1229_v25, %v1456_v8  ;;  %v368_v1 = vmul.f32 %v1229_v25, %v1465_v31 }
  0x5a   :  { %333 = vst.msk [vmem:[#allocation2 + $0x58] sm:$0xff] %vm321_vm0, %v316_v12  ;;  %334 = vst.msk [vmem:[#allocation2 + $0x60] sm:$0xff] %vm321_vm0, %v317_v0  ;;  %v369_v42 = vmul.f32 %v1229_v25, %v1467_v5  ;;  %v370_v2 = vmul.f32 %v1229_v25, %v1469_v59  ;;  %v371_v17 = vmul.f32 %v1229_v25, %v1479_v55 }
  0x5b   :  { %335 = vst.msk [vmem:[#allocation2 + $0x68] sm:$0xff] %vm321_vm0, %v318_v35  ;;  %336 = vst.msk [vmem:[#allocation2 + $0x70] sm:$0xff] %vm321_vm0, %v319_v50  ;;  %v680_v54 = vadd.f32 %v679_v48, %v678_v15  ;;  %v372_v63 = vmul.f32 %v1229_v25, %v1481_v29  ;;  %v373_v3 = vmul.f32 %v1229_v25, %v1483_v22 }
  0x5c   :  { %337 = vst.msk [vmem:[#allocation2 + $0x78] sm:$0xff] %vm321_vm0, %v320_v47  ;;  %v386_v13 = vmul.f32 %v1329_v38, %v1534_v34  ;;  %v387_v14 = vmul.f32 %v1329_v38, %v1536_v45  ;;  %v388_v15 = vmul.f32 %v1329_v38, %v1538_v51  ;;  %v389_v27 = vmul.f32 %v1329_v38, %v1540_v46 }
  0x5d   :  { %v390_v25 = vmul.f32 %v1329_v38, %v1542_v57  ;;  %v688_v9 = vmul.f32 0.00390625, %v680_v54  ;;  %v391_v60 = vmul.f32 %v1329_v38, %v1544_v21  ;;  %v392_v61 = vmul.f32 %v1329_v38, %v1552_v44 }
  0x5e   :  { %v393_v28 = vmul.f32 %v1329_v38, %v1554_v18  ;;  %v402_v33 = vadd.f32 %v386_v13, %v366_v36  ;;  %v403_v32 = vadd.f32 %v387_v14, %v367_v11  ;;  %v404_v16 = vadd.f32 %v388_v15, %v368_v1 }
  0x5f   :  { %v405_v26 = vadd.f32 %v389_v27, %v369_v42  ;;  %v694_v20 = vmul.f32 %v1605_v41, %v688_v9  ;;  %v406_v58 = vadd.f32 %v390_v25, %v370_v2  ;;  %v407_v23 = vadd.f32 %v391_v60, %v371_v17  ;;  %v346_v40 = vld [vmem:[#allocation2 + $0x41] sm:$0x7f] }
  0x60   :  { %v408_v30 = vadd.f32 %v392_v61, %v372_v63  ;;  %v347_v62 = vld [vmem:[#allocation2 + $0x49] sm:$0x7f]  ;;  %v348_v12 = vld [vmem:[#allocation2 + $0x51] sm:$0x7f]  ;;  %v409_v0 = vadd.f32 %v393_v28, %v373_v3  ;;  %v469_v35 = vmul.f32 %v1335_v43, %v1499_v39  ;;  %v470_v50 = vmul.f32 %v1335_v43, %v1501_v53 }
  0x61   :  { %v471_v38 = vmul.f32 %v1335_v43, %v1504_v37  ;;  %v696_v48 = vsel %vm695_vm2, %v694_v20, 0.0  ;;  %v349_v47 = vld [vmem:[#allocation2 + $0x59] sm:$0x7f]  ;;  %v350_v36 = vld [vmem:[#allocation2 + $0x61] sm:$0x7f]  ;;  %v418_v11 = vadd.f32 %v402_v33, %v346_v40  ;;  %v419_v1 = vadd.f32 %v403_v32, %v347_v62 }
  0x62   :  { %v420_v42 = vadd.f32 %v404_v16, %v348_v12  ;;  %697 = vadd.xlane.f32.xlu0 %v696_v48  ;;  %v351_v2 = vld [vmem:[#allocation2 + $0x69] sm:$0x7f]  ;;  %v352_v17 = vld [vmem:[#allocation2 + $0x71] sm:$0x7f]  ;;  %v421_v63 = vadd.f32 %v405_v26, %v349_v47  ;;  %v422_v3 = vadd.f32 %v406_v58, %v350_v36  ;;  %v472_v13 = vmul.f32 %v1335_v43, %v1506_v52 }
  0x63   :  { %v353_v54 = vld [vmem:[#allocation2 + $0x79] sm:$0x7f]  ;;  %v473_v14 = vmul.f32 %v1335_v43, %v1508_v24  ;;  %v423_v15 = vadd.f32 %v407_v23, %v351_v2  ;;  %v424_v27 = vadd.f32 %v408_v30, %v352_v17  ;;  %435 = vst.msk [vmem:[#allocation2 + $0x41] sm:$0x7f] %vm426_vm1, %v418_v11  ;;  %436 = vst.msk [vmem:[#allocation2 + $0x49] sm:$0x7f] %vm426_vm1, %v419_v1 }
  0x64   :  { %v425_v25 = vadd.f32 %v409_v0, %v353_v54  ;;  %437 = vst.msk [vmem:[#allocation2 + $0x51] sm:$0x7f] %vm426_vm1, %v420_v42  ;;  %v474_v9 = vmul.f32 %v1335_v43, %v1515_v19  ;;  %438 = vst.msk [vmem:[#allocation2 + $0x59] sm:$0x7f] %vm426_vm1, %v421_v63  ;;  %v475_v60 = vmul.f32 %v1335_v43, %v1517_v7  ;;  %v1852_v48 = vld [vmem:[#allocation10_spill] sm:$0xff]  ;;  %v1854_v1 = vld [vmem:[#allocation21_spill] sm:$0xff] }
  0x65   :  { %439 = vst.msk [vmem:[#allocation2 + $0x61] sm:$0x7f] %vm426_vm1, %v422_v3  ;;  %v487_v61 = vmul.f32 %v1340_v10, %v1534_v34  ;;  %v488_v28 = vmul.f32 %v1340_v10, %v1536_v45  ;;  %v489_v33 = vmul.f32 %v1340_v10, %v1538_v51  ;;  %440 = vst.msk [vmem:[#allocation2 + $0x69] sm:$0x7f] %vm426_vm1, %v423_v15  ;;  %v1853_v36 = vld [vmem:[#allocation18_spill] sm:$0xff]  ;;  %v1855_v42 = vld [vmem:[#allocation24_spill] sm:$0xff] }
  0x66   :  { %441 = vst.msk [vmem:[#allocation2 + $0x71] sm:$0x7f] %vm426_vm1, %v424_v27  ;;  %442 = vst.msk [vmem:[#allocation2 + $0x79] sm:$0x7f] %vm426_vm1, %v425_v25  ;;  %v490_v32 = vmul.f32 %v1340_v10, %v1540_v46  ;;  %v491_v43 = vmul.f32 %v1340_v10, %v1542_v57  ;;  %v492_v16 = vmul.f32 %v1340_v10, %v1544_v21  ;;  %v1856_v54 = vld [vmem:[#allocation22_spill] sm:$0xff] }
  0x67   :  { %v493_v26 = vmul.f32 %v1340_v10, %v1552_v44  ;;  %v501_v20 = vadd.f32 %v487_v61, %v469_v35  ;;  %v604_v58 = vadd.f32 %v1454_v49, %v1403_v6  ;;  %v502_v23 = vadd.f32 %v488_v28, %v470_v50 }
  0x68   :  { %v503_v30 = vadd.f32 %v489_v33, %v471_v38  ;;  %v504_v40 = vadd.f32 %v490_v32, %v472_v13  ;;  %v505_v62 = vadd.f32 %v491_v43, %v473_v14  ;;  %v605_v12 = vadd.f32 %v1456_v8, %v1411_v4  ;;  %v1857_v32 = vld [vmem:[#allocation19_spill] sm:$0xff] }
  0x69   :  { %v606_v0 = vadd.f32 %v1465_v31, %v1421_v56  ;;  %v607_v47 = vadd.f32 %v1467_v5, %v1852_v48  ;;  %v608_v10 = vadd.f32 %v1469_v59, %v1853_v36  ;;  %v506_v35 = vadd.f32 %v492_v16, %v474_v9 }
  0x6a   :  { %v507_v11 = vadd.f32 %v493_v26, %v475_v60  ;;  %v609_v6 = vadd.f32 %v1479_v55, %v1854_v1  ;;  %v620_v49 = vadd.f32 %v604_v58, %v1499_v39  ;;  %v451_v50 = vld [vmem:[#allocation2 + $0x48] sm:$0xff]  ;;  %v610_v4 = vadd.f32 %v1481_v29, %v1855_v42 }
  0x6b   :  { %v452_v38 = vld [vmem:[#allocation2 + $0x50] sm:$0xff]  ;;  %v621_v56 = vadd.f32 %v605_v12, %v1501_v53  ;;  %v622_v8 = vadd.f32 %v606_v0, %v1504_v37  ;;  %v623_v31 = vadd.f32 %v607_v47, %v1506_v52  ;;  %v453_v5 = vld [vmem:[#allocation2 + $0x58] sm:$0xff]  ;;  %v515_v2 = vadd.f32 %v501_v20, %v451_v50 }
  0x6c   :  { %v454_v59 = vld [vmem:[#allocation2 + $0x60] sm:$0xff]  ;;  %v516_v17 = vadd.f32 %v502_v23, %v452_v38  ;;  %v611_v55 = vadd.f32 %v1483_v22, %v1856_v54  ;;  %v624_v39 = vadd.f32 %v608_v10, %v1508_v24  ;;  %v455_v63 = vld [vmem:[#allocation2 + $0x68] sm:$0xff]  ;;  %v517_v14 = vadd.f32 %v503_v30, %v453_v5 }
  0x6d   :  { %v456_v3 = vld [vmem:[#allocation2 + $0x70] sm:$0xff]  ;;  %v457_v13 = vld [vmem:[#allocation2 + $0x78] sm:$0xff]  ;;  %v518_v29 = vadd.f32 %v504_v40, %v454_v59  ;;  %v625_v53 = vadd.f32 %v609_v6, %v1515_v19  ;;  %v636_v37 = vadd.f32 %v620_v49, %v1534_v34  ;;  %v519_v15 = vadd.f32 %v505_v62, %v455_v63  ;;  %529 = vst.msk [vmem:[#allocation2 + $0x48] sm:$0xff] %vm321_vm0, %v515_v2  ;;  %v1859_v5 = vld [vmem:[#allocation17_spill] sm:$0xff] }
  0x6e   :  { %v520_v52 = vadd.f32 %v506_v35, %v456_v3  ;;  %v521_v27 = vadd.f32 %v507_v11, %v457_v13  ;;  %530 = vst.msk [vmem:[#allocation2 + $0x50] sm:$0xff] %vm321_vm0, %v516_v17  ;;  %v637_v22 = vadd.f32 %v621_v56, %v1536_v45  ;;  %531 = vst.msk [vmem:[#allocation2 + $0x58] sm:$0xff] %vm321_vm0, %v517_v14  ;;  %v1061_v23 = vmov 0   ;;  %v1858_v56 = vld [vmem:[#allocation9_spill] sm:$0xff]  ;;  %v537_v2 = vld [vmem:[#allocation2 + $0x11] sm:$0x7f] }
  0x6f   :  { %532 = vst.msk [vmem:[#allocation2 + $0x60] sm:$0xff] %vm321_vm0, %v518_v29  ;;  %v638_v24 = vadd.f32 %v622_v8, %v1538_v51  ;;  %v639_v25 = vadd.f32 %v623_v31, %v1540_v46  ;;  %533 = vst.msk [vmem:[#allocation2 + $0x68] sm:$0xff] %vm321_vm0, %v519_v15  ;;  %v626_v19 = vadd.f32 %v610_v4, %v1517_v7  ;;  %v659_v60 = vsel %vm321_vm0, %v636_v37, 0.0  ;;  %v536_v31 = vld [vmem:[#allocation2 + $0x9] sm:$0x7f]  ;;  %v1860_v3 = vld [vmem:[#allocation11_spill] sm:$0xff] }
  0x70   :  { %534 = vst.msk [vmem:[#allocation2 + $0x70] sm:$0xff] %vm321_vm0, %v520_v52  ;;  %535 = vst.msk [vmem:[#allocation2 + $0x78] sm:$0xff] %vm321_vm0, %v521_v27  ;;  %v640_v9 = vadd.f32 %v624_v39, %v1542_v57  ;;  %v660_v61 = vsel %vm321_vm0, %v637_v22, 0.0  ;;  %v627_v43 = vadd.f32 %v611_v55, %v1857_v32  ;;  %v641_v16 = vadd.f32 %v625_v53, %v1544_v21  ;;  %v538_v17 = vld [vmem:[#allocation2 + $0x19] sm:$0x7f]  ;;  %v1862_v29 = vld [vmem:[#allocation13_spill] sm:$0xff] }
  0x71   :  { %v661_v28 = vadd.f32 %v660_v61, %v659_v60  ;;  %v662_v33 = vsel %vm321_vm0, %v638_v24, 0.0  ;;  %v664_v26 = vsel %vm321_vm0, %v639_v25, 0.0  ;;  %v642_v58 = vadd.f32 %v626_v19, %v1552_v44  ;;  %944 = vset.pattern.permute.xlu1 %v1061_v23  ;;  %945 = vset.pattern.permute.xlu0 %v1061_v23  ;;  %v539_v54 = vld [vmem:[#allocation2 + $0x21] sm:$0x7f]  ;;  %v540_v55 = vld [vmem:[#allocation2 + $0x29] sm:$0x7f] }
  0x72   :  { %v666_v7 = vsel %vm321_vm0, %v640_v9, 0.0  ;;  %v643_v40 = vadd.f32 %v627_v43, %v1554_v18  ;;  %v668_v62 = vsel %vm321_vm0, %v641_v16, 0.0  ;;  %v1710_v8 = vsub.s32 0, %v1858_v56  ;;  %v541_v39 = vld [vmem:[#allocation2 + $0x31] sm:$0x7f]  ;;  %v1861_v14 = vld [vmem:[#allocation12_spill] sm:$0xff] }
  0x73   :  { %v663_v20 = vadd.f32 %v662_v33, %v661_v28  ;;  %v670_v0 = vsel %vm321_vm0, %v642_v58, 0.0  ;;  %v542_v63 = vld [vmem:[#allocation2 + $0x39] sm:$0x7f]  ;;  %v1863_v37 = vld [vmem:[#allocation14_spill] sm:$0xff]  ;;  %v1864_v52 = vld [vmem:[#allocation15_spill] sm:$0xff] }
  0x74   :  { %v672_v47 = vsel %vm321_vm0, %v643_v40, 0.0  ;;  %v553_v59 = vrot.slane %v1859_v5, %v1710_v8  ;;  %v1865_v22 = vld [vmem:[#allocation16_spill] sm:$0xff]  ;;  %v1866_v25 = vld [vmem:[#allocation23_spill] sm:$0xff]  ;;  %v691_v16 = vld [vmem:[%s1796_s2] sm:$0x3] }
  0x75   :  { %v665_v30 = vadd.f32 %v664_v26, %v663_v20  ;;  %v543_v40 = vld [vmem:[#allocation2 + $0x49] sm:$0x7f] }
  0x76   :  { %v554_v13 = vmul.f32 %v553_v59, %v1860_v3  ;;  %v556_v53 = vmul.f32 %v553_v59, %v1862_v29  ;;  %v557_v15 = vmul.f32 %v553_v59, %v1863_v37  ;;  %v558_v27 = vmul.f32 %v553_v59, %v1864_v52 }
  0x77   :  { %v667_v12 = vadd.f32 %v666_v7, %v665_v30  ;;  %v559_v24 = vmul.f32 %v553_v59, %v1865_v22  ;;  %v560_v19 = vmul.f32 %v553_v59, %v1866_v25 }
  0x78   :  { %v568_v9 = vadd.f32 %v554_v13, %v536_v31  ;;  %v570_v61 = vadd.f32 %v556_v53, %v538_v17  ;;  %v571_v28 = vadd.f32 %v557_v15, %v539_v54  ;;  %v572_v33 = vadd.f32 %v558_v27, %v540_v55  ;;  %v1755_v17 = vld [vmem:[%s1798_s4] sm:$0x1] }
  0x79   :  { %v669_v48 = vadd.f32 %v668_v62, %v667_v12  ;;  %v573_v32 = vadd.f32 %v559_v24, %v541_v39  ;;  %v574_v43 = vadd.f32 %v560_v19, %v542_v63  ;;  %v544_v62 = vld [vmem:[#allocation2 + $0x51] sm:$0x7f]  ;;  %v545_v12 = vld [vmem:[#allocation2 + $0x59] sm:$0x7f] }
  0x7a   :  { %582 = vst.msk [vmem:[#allocation2 + $0x9] sm:$0x7f] %vm426_vm1, %v568_v9  ;;  %584 = vst.msk [vmem:[#allocation2 + $0x19] sm:$0x7f] %vm426_vm1, %v570_v61 }
  0x7b   :  { %v671_v36 = vadd.f32 %v670_v0, %v669_v48  ;;  %585 = vst.msk [vmem:[#allocation2 + $0x21] sm:$0x7f] %vm426_vm1, %v571_v28  ;;  %586 = vst.msk [vmem:[#allocation2 + $0x29] sm:$0x7f] %vm426_vm1, %v572_v33  ;;  %v546_v0 = vld [vmem:[#allocation2 + $0x61] sm:$0x7f] }
  0x7c   :  { %587 = vst.msk [vmem:[#allocation2 + $0x31] sm:$0x7f] %vm426_vm1, %v573_v32  ;;  %588 = vst.msk [vmem:[#allocation2 + $0x39] sm:$0x7f] %vm426_vm1, %v574_v43  ;;  %v547_v48 = vld [vmem:[#allocation2 + $0x69] sm:$0x7f] }
  0x7d   :  { %v673_v10 = vadd.f32 %v672_v47, %v671_v36  ;;  %v548_v47 = vld [vmem:[#allocation2 + $0x71] sm:$0x7f]  ;;  %v549_v36 = vld [vmem:[#allocation2 + $0x79] sm:$0x7f] }
  0x7f   :  { %v681_v35 = vsel %vm321_vm0, %v673_v10, 0.0  ;;  %v561_v10 = vmul.f32 %v553_v59, %v1534_v34 }
  0x80   :  { %v682_v11 = vrot.slane %v681_v35, 4 }
  0x81   :  { %v716_v55 = vld [vmem:[#allocation2 + $0x8] sm:$0xff]  ;;  %v718_v3 = vld [vmem:[#allocation2 + $0x18] sm:$0xff] }
  0x82   :  { %v683_v1 = vadd.f32 %v682_v11, %v681_v35  ;;  %v562_v35 = vmul.f32 %v553_v59, %v1536_v45  ;;  %v563_v11 = vmul.f32 %v553_v59, %v1538_v51  ;;  %v719_v13 = vld [vmem:[#allocation2 + $0x20] sm:$0xff] }
  0x83   :  { %v721_v29 = vld [vmem:[#allocation2 + $0x30] sm:$0xff]  ;;  %v722_v53 = vld [vmem:[#allocation2 + $0x38] sm:$0xff] }
  0x84   :  { %v684_v6 = vrot.slane %v683_v1, 2 }
  0x86   :  { %v685_v49 = vadd.f32 %v684_v6, %v683_v1  ;;  %v564_v1 = vmul.f32 %v553_v59, %v1540_v46  ;;  %v565_v6 = vmul.f32 %v553_v59, %v1542_v57  ;;  %v1748_v46 = vld [vmem:[%s1797_s3] sm:$0x3]  ;;  %s1062_s3 = smov [#allocation6]  }
  0x87   :  { %s894_s4 = sshll.u32 %s1062_s3, 4  ;;  %s895_s4 = int_to_ptr.vmem [resolvable:$true] %s894_s4 }
  0x88   :  { %v686_v50 = vrot.slane %v685_v49, 1  ;;  %v579_v56 = vadd.f32 %v565_v6, %v547_v48  ;;  %s1032_s24 = scalar_lea.vmem %s895_s4, 2048  ;;  %p1037_p9 = scmp.lt.s32.totalorder %s895_s4, %s895_s4 }
  0x89   :  { %p1033_p8 = scmp.ne.s32.totalorder %s895_s4, %s1032_s24  ;;  %p1038_p10 = scmp.lt.s32.totalorder %s1032_s24, %s1032_s24 }
  0x8a   :  { %v687_v38 = vadd.f32 %v686_v50, %v685_v49  ;;  %v566_v49 = vmul.f32 %v553_v59, %v1544_v21  ;;  %v567_v50 = vmul.f32 %v553_v59, %v1552_v44  ;;  %593 = vst.msk [vmem:[#allocation2 + $0x69] sm:$0x7f] %vm426_vm1, %v579_v56 }
  0x8b   :  { %p1039_p11 = por %p1038_p10, %p1037_p9 }
  0x8c   :  { %v689_v42 = vmul.f32 0.00390625, %v687_v38  ;;  %v575_v38 = vadd.f32 %v561_v10, %v543_v40  ;;  %v580_v31 = vadd.f32 %v566_v49, %v548_v47  ;;  %v581_v5 = vadd.f32 %v567_v50, %v549_v36 }
  0x8d   :  { %p1040_p12 = pnand %p1039_p11, %p1033_p8 }
  0x8e   :  { %v791_v18 = vmul.f32 %v1605_v41, %v689_v42  ;;  %v555_v41 = vmul.f32 %v553_v59, %v1861_v14  ;;  %v576_v42 = vadd.f32 %v562_v35, %v544_v62  ;;  %589 = vst.msk [vmem:[#allocation2 + $0x49] sm:$0x7f] %vm426_vm1, %v575_v38  ;;  %594 = vst.msk [vmem:[#allocation2 + $0x71] sm:$0x7f] %vm426_vm1, %v580_v31  ;;  %v715_v14 = vld [vmem:[#allocation2] sm:$0xff] }
  0x8f   :  { %595 = vst.msk [vmem:[#allocation2 + $0x79] sm:$0x7f] %vm426_vm1, %v581_v5 }
  0x90   :  { %v792_v4 = vsel %vm695_vm2, %v791_v18, 0.0  ;;  %v569_v60 = vadd.f32 %v555_v41, %v537_v2  ;;  %v577_v18 = vadd.f32 %v563_v11, %v545_v12  ;;  %590 = vst.msk [vmem:[#allocation2 + $0x51] sm:$0x7f] %vm426_vm1, %v576_v42  ;;  %v720_v41 = vld [vmem:[#allocation2 + $0x28] sm:$0xff] }
  0x91   :  { %793 = vadd.xlane.f32.xlu0 %v792_v4  ;;  %v578_v4 = vadd.f32 %v564_v1, %v546_v0 }
  0x92   :  { %583 = vst.msk [vmem:[#allocation2 + $0x11] sm:$0x7f] %vm426_vm1, %v569_v60  ;;  %591 = vst.msk [vmem:[#allocation2 + $0x59] sm:$0x7f] %vm426_vm1, %v577_v18 }
  0x93   :  { %592 = vst.msk [vmem:[#allocation2 + $0x61] sm:$0x7f] %vm426_vm1, %v578_v4 }
  0x99   :  { %v717_v39 = vld [vmem:[#allocation2 + $0x10] sm:$0xff] }
  0xef   :  { %v698_v26 = vpop.xlane.xlu0 %697 }
  0xf0   :  { %v699_v20 = vadd.f32 %v698_v26, %v691_v16 }
  0xf2   :  { %v700_v58 = vmax.f32 %v699_v20, 0.0 }
  0xf4   :  { %703 = vperm.xlu1 %944, %v700_v58  }
 0x11e   :  { %v794_v7 = vpop.xlane.xlu0 %793 }
 0x11f   :  { %v795_v23 = vadd.f32 %v794_v7, %v691_v16 }
 0x121   :  { %v796_v30 = vmax.f32 %v795_v23, 0.0 }
 0x123   :  { %799 = vperm.xlu1 %944, %v796_v30  }
 0x173   :  { %v704_v51 = vpop.permute.xlu1 %703 }
 0x174   :  { %v706_v57 = vmul.f32 %v704_v51, %v1748_v46 }
 0x176   :  { %v707_v34 = vsel %vm695_vm2, %v706_v57, 0.0 }
 0x177   :  { %v708_v45 = vrot.slane %v707_v34, 4 }
 0x179   :  { %v709_v21 = vadd.f32 %v708_v45, %v707_v34 }
 0x17b   :  { %v710_v44 = vrot.slane %v709_v21, 2 }
 0x17d   :  { %v711_v59 = vadd.f32 %v710_v44, %v709_v21 }
 0x17f   :  { %v712_v2 = vrot.slane %v711_v59, 1 }
 0x181   :  { %v713_v54 = vadd.f32 %v712_v2, %v711_v59 }
 0x183   :  { %v714_v63 = vadd.f32 %v713_v54, %v1755_v17 }
 0x185   :  { %v726_v37 = vrot.slane %v714_v63, %v1710_v8 }
 0x187   :  { %v727_v15 = vadd.f32 %v726_v37, %v715_v14  ;;  %v728_v52 = vadd.f32 %v726_v37, %v716_v55  ;;  %v729_v27 = vadd.f32 %v726_v37, %v717_v39  ;;  %v730_v22 = vadd.f32 %v726_v37, %v718_v3  ;;  %v812_v14 = vld [vmem:[#allocation2 + $0x40] sm:$0xff] }
 0x188   :  { %v731_v24 = vadd.f32 %v726_v37, %v719_v13  ;;  %v732_v25 = vadd.f32 %v726_v37, %v720_v41  ;;  %v733_v19 = vadd.f32 %v726_v37, %v721_v29  ;;  %v734_v9 = vadd.f32 %v726_v37, %v722_v53  ;;  %v813_v41 = vld [vmem:[#allocation2 + $0x48] sm:$0xff]  ;;  %v814_v53 = vld [vmem:[#allocation2 + $0x50] sm:$0xff]  ;;  %v815_v37 = vld [vmem:[#allocation2 + $0x58] sm:$0xff] }
 0x189   :  { %v735_v60 = vsub.f32 0.0, %v727_v15  ;;  %v736_v61 = vsub.f32 0.0, %v728_v52  ;;  %v737_v28 = vsub.f32 0.0, %v729_v27  ;;  %v738_v33 = vsub.f32 0.0, %v730_v22  ;;  %v816_v15 = vld [vmem:[#allocation2 + $0x60] sm:$0xff]  ;;  %v817_v52 = vld [vmem:[#allocation2 + $0x68] sm:$0xff] }
 0x18a   :  { %v739_v32 = vsub.f32 0.0, %v731_v24  ;;  %v740_v43 = vsub.f32 0.0, %v732_v25  ;;  %v741_v16 = vsub.f32 0.0, %v733_v19  ;;  %v742_v7 = vsub.f32 0.0, %v734_v9  ;;  %v818_v27 = vld [vmem:[#allocation2 + $0x70] sm:$0xff]  ;;  %v819_v22 = vld [vmem:[#allocation2 + $0x78] sm:$0xff] }
 0x18b   :  { %v743_v26 = vmul.f32 1.442695, %v735_v60  ;;  %v745_v20 = vmul.f32 1.442695, %v736_v61  ;;  %v747_v58 = vmul.f32 1.442695, %v737_v28 }
 0x18c   :  { %v749_v23 = vmul.f32 1.442695, %v738_v33  ;;  %v751_v30 = vmul.f32 1.442695, %v739_v32  ;;  %v753_v40 = vmul.f32 1.442695, %v740_v43 }
 0x18d   :  { %946 = vpow2.f32 %v743_v26  ;;  %v755_v62 = vmul.f32 1.442695, %v741_v16  ;;  %v757_v12 = vmul.f32 1.442695, %v742_v7 }
 0x18e   :  { %948 = vpow2.f32 %v745_v20 }
 0x18f   :  { %950 = vpow2.f32 %v747_v58 }
 0x190   :  { %952 = vpow2.f32 %v749_v23 }
 0x191   :  { %954 = vpow2.f32 %v751_v30 }
 0x192   :  { %956 = vpow2.f32 %v753_v40 }
 0x193   :  { %958 = vpow2.f32 %v755_v62 }
 0x194   :  { %960 = vpow2.f32 %v757_v12 }
 0x197   :  { %v947_v0 = vpop.eup %946 }
 0x198   :  { %v949_v48 = vpop.eup %948  ;;  %v759_v47 = vadd.f32 1.0, %v947_v0 }
 0x199   :  { %v951_v36 = vpop.eup %950  ;;  %v760_v10 = vadd.f32 1.0, %v949_v48 }
 0x19a   :  { %v953_v35 = vpop.eup %952  ;;  %v761_v11 = vadd.f32 1.0, %v951_v36  ;;  %962 = vrcp.f32 %v759_v47 }
 0x19b   :  { %v955_v1 = vpop.eup %954  ;;  %v762_v6 = vadd.f32 1.0, %v953_v35  ;;  %964 = vrcp.f32 %v760_v10 }
 0x19c   :  { %v957_v49 = vpop.eup %956  ;;  %v763_v50 = vadd.f32 1.0, %v955_v1  ;;  %966 = vrcp.f32 %v761_v11 }
 0x19d   :  { %v959_v38 = vpop.eup %958  ;;  %v764_v42 = vadd.f32 1.0, %v957_v49  ;;  %968 = vrcp.f32 %v762_v6 }
 0x19e   :  { %v961_v18 = vpop.eup %960  ;;  %v765_v4 = vadd.f32 1.0, %v959_v38  ;;  %970 = vrcp.f32 %v763_v50 }
 0x19f   :  { %v766_v56 = vadd.f32 1.0, %v961_v18  ;;  %972 = vrcp.f32 %v764_v42 }
 0x1a0   :  { %974 = vrcp.f32 %v765_v4 }
 0x1a1   :  { %976 = vrcp.f32 %v766_v56 }
 0x1a2   :  { %v800_v31 = vpop.permute.xlu1 %799 }
 0x1a3   :  { %v802_v5 = vmul.f32 %v800_v31, %v1748_v46 }
 0x1a4   :  { %v963_v51 = vpop.eup %962 }
 0x1a5   :  { %v803_v57 = vsel %vm695_vm2, %v802_v5, 0.0  ;;  %v965_v34 = vpop.eup %964  ;;  %783 = vst.msk [vmem:[#allocation6] sm:$0xff] %vm321_vm0, %v963_v51 }
 0x1a6   :  { %v804_v45 = vrot.slane %v803_v57, 4  ;;  %v967_v21 = vpop.eup %966  ;;  %784 = vst.msk [vmem:[#allocation6 + $0x8] sm:$0xff] %vm321_vm0, %v965_v34 }
 0x1a7   :  { %v969_v44 = vpop.eup %968  ;;  %785 = vst.msk [vmem:[#allocation6 + $0x10] sm:$0xff] %vm321_vm0, %v967_v21 }
 0x1a8   :  { %v805_v59 = vadd.f32 %v804_v45, %v803_v57  ;;  %v971_v2 = vpop.eup %970  ;;  %786 = vst.msk [vmem:[#allocation6 + $0x18] sm:$0xff] %vm321_vm0, %v969_v44 }
 0x1a9   :  { %v973_v54 = vpop.eup %972  ;;  %787 = vst.msk [vmem:[#allocation6 + $0x20] sm:$0xff] %vm321_vm0, %v971_v2 }
 0x1aa   :  { %v806_v46 = vrot.slane %v805_v59, 2  ;;  %v975_v55 = vpop.eup %974  ;;  %788 = vst.msk [vmem:[#allocation6 + $0x28] sm:$0xff] %vm321_vm0, %v973_v54 }
 0x1ab   :  { %v977_v39 = vpop.eup %976  ;;  %789 = vst.msk [vmem:[#allocation6 + $0x30] sm:$0xff] %vm321_vm0, %v975_v55 }
 0x1ac   :  { %v807_v63 = vadd.f32 %v806_v46, %v805_v59  ;;  %790 = vst.msk [vmem:[#allocation6 + $0x38] sm:$0xff] %vm321_vm0, %v977_v39 }
 0x1ae   :  { %v808_v3 = vrot.slane %v807_v63, 1 }
 0x1b0   :  { %v809_v13 = vadd.f32 %v808_v3, %v807_v63 }
 0x1b2   :  { %v810_v29 = vadd.f32 %v809_v13, %v1755_v17 }
 0x1b4   :  { %v823_v24 = vrot.slane %v810_v29, %v1710_v8 }
 0x1b6   :  { %v824_v25 = vadd.f32 %v823_v24, %v812_v14  ;;  %v825_v19 = vadd.f32 %v823_v24, %v813_v41  ;;  %v826_v9 = vadd.f32 %v823_v24, %v814_v53  ;;  %v827_v60 = vadd.f32 %v823_v24, %v815_v37 }
 0x1b7   :  { %v828_v61 = vadd.f32 %v823_v24, %v816_v15  ;;  %v829_v28 = vadd.f32 %v823_v24, %v817_v52  ;;  %v830_v33 = vadd.f32 %v823_v24, %v818_v27  ;;  %v831_v32 = vadd.f32 %v823_v24, %v819_v22 }
 0x1b8   :  { %v832_v43 = vsub.f32 0.0, %v824_v25  ;;  %v833_v16 = vsub.f32 0.0, %v825_v19  ;;  %v834_v26 = vsub.f32 0.0, %v826_v9  ;;  %v835_v17 = vsub.f32 0.0, %v827_v60 }
 0x1b9   :  { %v836_v20 = vsub.f32 0.0, %v828_v61  ;;  %v837_v58 = vsub.f32 0.0, %v829_v28  ;;  %v838_v7 = vsub.f32 0.0, %v830_v33  ;;  %v839_v62 = vsub.f32 0.0, %v831_v32 }
 0x1ba   :  { %v840_v23 = vmul.f32 1.442695, %v832_v43  ;;  %v842_v30 = vmul.f32 1.442695, %v833_v16  ;;  %v844_v40 = vmul.f32 1.442695, %v834_v26 }
 0x1bb   :  { %v846_v8 = vmul.f32 1.442695, %v835_v17  ;;  %v848_v12 = vmul.f32 1.442695, %v836_v20  ;;  %v850_v0 = vmul.f32 1.442695, %v837_v58 }
 0x1bc   :  { %978 = vpow2.f32 %v840_v23  ;;  %v852_v48 = vmul.f32 1.442695, %v838_v7  ;;  %v854_v47 = vmul.f32 1.442695, %v839_v62 }
 0x1bd   :  { %980 = vpow2.f32 %v842_v30 }
 0x1be   :  { %982 = vpow2.f32 %v844_v40 }
 0x1bf   :  { %984 = vpow2.f32 %v846_v8 }
 0x1c0   :  { %986 = vpow2.f32 %v848_v12 }
 0x1c1   :  { %988 = vpow2.f32 %v850_v0 }
 0x1c2   :  { %990 = vpow2.f32 %v852_v48 }
 0x1c3   :  { %992 = vpow2.f32 %v854_v47 }
 0x1c6   :  { %v979_v36 = vpop.eup %978 }
 0x1c7   :  { %v981_v10 = vpop.eup %980  ;;  %v856_v35 = vadd.f32 1.0, %v979_v36 }
 0x1c8   :  { %v983_v11 = vpop.eup %982  ;;  %v857_v1 = vadd.f32 1.0, %v981_v10 }
 0x1c9   :  { %v985_v6 = vpop.eup %984  ;;  %v858_v49 = vadd.f32 1.0, %v983_v11  ;;  %994 = vrcp.f32 %v856_v35 }
 0x1ca   :  { %v987_v50 = vpop.eup %986  ;;  %v859_v38 = vadd.f32 1.0, %v985_v6  ;;  %996 = vrcp.f32 %v857_v1 }
 0x1cb   :  { %v989_v42 = vpop.eup %988  ;;  %v860_v18 = vadd.f32 1.0, %v987_v50  ;;  %998 = vrcp.f32 %v858_v49 }
 0x1cc   :  { %v991_v4 = vpop.eup %990  ;;  %v861_v56 = vadd.f32 1.0, %v989_v42  ;;  %1000 = vrcp.f32 %v859_v38 }
 0x1cd   :  { %v993_v31 = vpop.eup %992  ;;  %v862_v5 = vadd.f32 1.0, %v991_v4  ;;  %1002 = vrcp.f32 %v860_v18 }
 0x1ce   :  { %v863_v51 = vadd.f32 1.0, %v993_v31  ;;  %1004 = vrcp.f32 %v861_v56 }
 0x1cf   :  { %1006 = vrcp.f32 %v862_v5 }
 0x1d0   :  { %1008 = vrcp.f32 %v863_v51 }
 0x1d3   :  { %v995_v57 = vpop.eup %994 }
 0x1d4   :  { %v997_v34 = vpop.eup %996  ;;  %881 = vst.msk [vmem:[#allocation6 + $0x40] sm:$0xff] %vm321_vm0, %v995_v57 }
 0x1d5   :  { %v999_v45 = vpop.eup %998  ;;  %882 = vst.msk [vmem:[#allocation6 + $0x48] sm:$0xff] %vm321_vm0, %v997_v34 }
 0x1d6   :  { %v1001_v21 = vpop.eup %1000  ;;  %883 = vst.msk [vmem:[#allocation6 + $0x50] sm:$0xff] %vm321_vm0, %v999_v45 }
 0x1d7   :  { %v1003_v44 = vpop.eup %1002  ;;  %884 = vst.msk [vmem:[#allocation6 + $0x58] sm:$0xff] %vm321_vm0, %v1001_v21 }
 0x1d8   :  { %v1005_v59 = vpop.eup %1004  ;;  %885 = vst.msk [vmem:[#allocation6 + $0x60] sm:$0xff] %vm321_vm0, %v1003_v44 }
 0x1d9   :  { %v1007_v2 = vpop.eup %1006  ;;  %886 = vst.msk [vmem:[#allocation6 + $0x68] sm:$0xff] %vm321_vm0, %v1005_v59 }
 0x1da   :  { %v1009_v54 = vpop.eup %1008  ;;  %887 = vst.msk [vmem:[#allocation6 + $0x70] sm:$0xff] %vm321_vm0, %v1007_v2 }
 0x1db   :  { %888 = vst.msk [vmem:[#allocation6 + $0x78] sm:$0xff] %vm321_vm0, %v1009_v54 }
 0x1dc   :  { %1043 = shalt.err (!%p1040_p12)
}
 0x1dd   :  { %s1044_s27 = scalar_lea.hbm %s1801_s7, 2048 }
 0x1de   :  { %p1045_p13 = scmp.ne.s32.totalorder %s1801_s7, %s1044_s27  ;;  %p1048_p0 = scmp.lt.u32.totalorder %s1044_s27, %s1801_s7 }
 0x1e0   :  { %p1050_p1 = pnand %p1048_p0, %p1045_p13 }
 0x1e2   :  { %1053 = shalt.err (!%p1050_p1)
}
 0x1e3   :  { %900 = dma.vmem_to_hbm [thread:$0]  %s895_s4, 2048, %s1801_s7, [#allocation5], %s1059_s11, %s1059_s11, %s1060_s12  }
 0x1e4   :  { %1056 = dma.done.wait [#allocation5], 2048  }
 0x1e5   :  { %1057 = vsyncadd [#allocation5], 4294965248 }
 0x1e6   :  { %904 = vsyncpa [#allocation4], 1 }
 0x1e7   :  { %905 = vsyncpa [#allocation5], 1 }

</bundles_post_ra>
